<compile_context>
chip_gen: v5e
topology: v5e:2x2
jax: 0.10.0
libtpu: 0.0.40
codegen_flags: <defaults>
</compile_context>

<pallas_src>
import functools
import math

import jax
import jax.numpy as jnp
from jax.experimental import pallas as pl
from jax.experimental.pallas import tpu as pltpu

NUM_GROUPS = 32  # nn.GroupNorm(32, feature_dim)


# ---------------------------------------------------------------------------
# Kernel 1: backbone stand-in + GroupNorm + ReLU + projection (tiled reduction)
# ---------------------------------------------------------------------------
def _backbone_kernel(x_ref, wimg_ref, bimg_ref, gng_ref, gnb_ref,
                     gmat_ref, gmat_t_ref, wp_ref, bp_ref,
                     feats_ref, proj_ref, acc_ref,
                     *, inv_s, inv_gs, eps):
    s = pl.program_id(1)

    @pl.when(s == 0)
    def _():
        acc_ref[...] = jnp.zeros_like(acc_ref)

    # Hot loop: pure VPU element-wise accumulation; the single lane reduction
    # is deferred to the last grid step.
    acc_ref[...] += x_ref[...].astype(jnp.float32)

    @pl.when(s == pl.num_programs(1) - 1)
    def _():
        pooled = jnp.sum(acc_ref[...], axis=-1) * inv_s               # (BNt, C)
        # TODO(synk): real `image_model` backbone unavailable; stand-in = pool + Linear.
        feats = jnp.dot(pooled, wimg_ref[...],
                        preferred_element_type=jnp.float32) + bimg_ref[...]

        # GroupNorm(32, F) via group-membership matmuls (no awkward reshapes).
        g = gmat_ref[...]                                             # (F, NG)
        gt = gmat_t_ref[...]                                          # (NG, F)
        mean_g = jnp.dot(feats, g, preferred_element_type=jnp.float32) * inv_gs
        msq_g = jnp.dot(feats * feats, g,
                        preferred_element_type=jnp.float32) * inv_gs
        var_g = msq_g - mean_g * mean_g
        mean_c = jnp.dot(mean_g, gt, preferred_element_type=jnp.float32)
        var_c = jnp.dot(var_g, gt, preferred_element_type=jnp.float32)
        normed = (feats - mean_c) * jax.lax.rsqrt(var_c + eps)
        feats_gn = jnp.maximum(normed * gng_ref[...] + gnb_ref[...], 0.0)  # ReLU

        feats_ref[...] = feats_gn                                     # (BNt, F)
        proj_ref[...] = jnp.dot(feats_gn, wp_ref[...],
                                preferred_element_type=jnp.float32) + bp_ref[...]


# ---------------------------------------------------------------------------
# Kernel 2: pos-encoding + transformer encoder layer + pooling + classifier
# ---------------------------------------------------------------------------
def _head_kernel(feats_ref, proj_ref, lens_ref, pe_ref,
                 wqh_ref, bqh_ref, wkh_ref, bkh_ref, wvh_ref, bvh_ref,
                 woh_ref, bo_ref, ln1g_ref, ln1b_ref,
                 w1_ref, b1_ref, w2_ref, b2_ref, ln2g_ref, ln2b_ref,
                 wcf_ref, wcp_ref, bc_ref, out_ref,
                 *, num_heads, pooling):
    feats = feats_ref[...]                         # (B, N, F)  relu(groupnorm) feats
    x = proj_ref[...]                              # (B, N, D)  projected feats
    B, N, D = x.shape
    dh = D // num_heads
    scale = 1.0 / math.sqrt(dh)

    lens = lens_ref[...]                           # (B, 1, 1) int32
    pos = jax.lax.broadcasted_iota(jnp.int32, (B, N, 1), 1)
    valid = (pos < lens).astype(jnp.float32)       # (B, N, 1)

    # ContinuousPosEncoding: xs[:lens[b], b] += pe[:lens[b]]; dropout = identity.
    x = x + pe_ref[...][None, :, :] * valid

    def layer_norm(v, g, b):
        mu = jnp.mean(v, axis=-1, keepdims=True)
        var = jnp.mean(jnp.square(v - mu), axis=-1, keepdims=True)
        return (v - mu) * jax.lax.rsqrt(var + 1e-5) * g + b

    # ---- nn.TransformerEncoderLayer (post-norm, relu, eval: dropouts = id) ----
    x2d = x.reshape(B * N, D)
    attn2d = jnp.zeros((B * N, D), jnp.float32)
    for h in range(num_heads):                     # static loop; heads indexed on a
        qh = (jnp.dot(x2d, wqh_ref[h],             # leading axis (no lane slicing)
                      preferred_element_type=jnp.float32) + bqh_ref[h]).reshape(B, N, dh)
        kh = (jnp.dot(x2d, wkh_ref[h],
                      preferred_element_type=jnp.float32) + bkh_ref[h]).reshape(B, N, dh)
        vh = (jnp.dot(x2d, wvh_ref[h],
                      preferred_element_type=jnp.float32) + bvh_ref[h]).reshape(B, N, dh)
        scores = jnp.einsum('bqd,bkd->bqk', qh, kh,
                            preferred_element_type=jnp.float32) * scale
        scores = scores - jnp.max(scores, axis=-1, keepdims=True)
        p = jnp.exp(scores)
        p = p / jnp.sum(p, axis=-1, keepdims=True)
        ctx = jnp.einsum('bqk,bkd->bqd', p, vh,
                         preferred_element_type=jnp.float32)           # (B, N, dh)
        # concat(heads) @ Wo  ==  sum_h ctx_h @ Wo[h*dh:(h+1)*dh, :]
        attn2d = attn2d + jnp.dot(ctx.reshape(B * N, dh), woh_ref[h],
                                  preferred_element_type=jnp.float32)
    attn2d = attn2d + bo_ref[...]

    x1 = layer_norm(x2d + attn2d, ln1g_ref[...], ln1b_ref[...])        # norm1
    ff = jnp.maximum(jnp.dot(x1, w1_ref[...],
                             preferred_element_type=jnp.float32) + b1_ref[...], 0.0)
    ff = jnp.dot(ff, w2_ref[...], preferred_element_type=jnp.float32) + b2_ref[...]
    trans = layer_norm(x1 + ff, ln2g_ref[...], ln2b_ref[...]).reshape(B, N, D)

    # ---- _pool over valid timesteps + classifier ----
    if pooling == "sum":
        w = valid
    elif pooling == "last_timestep":
        w = (pos == (lens - 1)).astype(jnp.float32)
    else:
        raise ValueError(f"Unknown pooling method: {pooling}")
    pooled_f = jnp.sum(feats * w, axis=1)          # (B, F)
    pooled_t = jnp.sum(trans * w, axis=1)          # (B, D)
    # cat([feats, trans], dim=-1) @ Wc  ==  feats @ Wc[:F] + trans @ Wc[F:]
    out_ref[...] = (jnp.dot(pooled_f, wcf_ref[...], preferred_element_type=jnp.float32)
                    + jnp.dot(pooled_t, wcp_ref[...], preferred_element_type=jnp.float32)
                    + bc_ref[...])


# ---------------------------------------------------------------------------
# Wrapper
# ---------------------------------------------------------------------------
def mip_forward(images, lens, params, *, num_heads, pooling="sum"):
    """images: (B, N, C, H, W) f32; lens: (B,) int; returns (B, num_classes)."""
    B, N, C, H, W = images.shape
    BN, S = B * N, H * W
    F = params["w_img"].shape[1]
    P = params["w_proj"].shape[1]
    D = P                       # transformer_dim = projection_dim with image_shape=(1,1)
    NC = params["b_cls"].shape[-1]

    # Free row-major reshape of the only large tensor (no transpose, no HBM copy).
    x = images.reshape(BN, C, S)

    # Spatial tile: biggest that divides S (keeps per-buffer tile small enough for
    # v7x's 64 MiB VMEM and the default scoped limits on v5e/v6e).
    ts = S
    for cand in (2048, 1024, 512, 256, 128):
        if S % cand == 0:
            ts = cand
            break
    bn_t = 8 if BN % 8 == 0 else BN
    grid = (BN // bn_t, S // ts)

    const = lambda i, s: (0, 0)
    cost = pl.CostEstimate(
        flops=int(BN * C * S + 2 * BN * (C * F + 4 * F * NUM_GROUPS + F * P)),
        transcendentals=int(BN * NUM_GROUPS),
        bytes_accessed=int(4 * (BN * C * S + C * F + 6 * F + 2 * F * NUM_GROUPS
                                + F * P + P + BN * (F + P))),
    )

    feats, proj = pl.pallas_call(
        functools.partial(_backbone_kernel, inv_s=1.0 / S,
                          inv_gs=float(NUM_GROUPS) / F, eps=1e-5),
        out_shape=(jax.ShapeDtypeStruct((BN, F), jnp.float32),
                   jax.ShapeDtypeStruct((BN, P), jnp.float32)),
        grid_spec=pltpu.PrefetchScalarGridSpec(
            num_scalar_prefetch=0,
            grid=grid,
            in_specs=[
                pl.BlockSpec((bn_t, C, ts), lambda i, s: (i, 0, s)),
                pl.BlockSpec((C, F), const),
                pl.BlockSpec((1, F), const),
                pl.BlockSpec((1, F), const),
                pl.BlockSpec((1, F), const),
                pl.BlockSpec((F, NUM_GROUPS), const),
                pl.BlockSpec((NUM_GROUPS, F), const),
                pl.BlockSpec((F, P), const),
                pl.BlockSpec((1, P), const),
            ],
            out_specs=(pl.BlockSpec((bn_t, F), lambda i, s: (i, 0)),
                       pl.BlockSpec((bn_t, P), lambda i, s: (i, 0))),
            scratch_shapes=[pltpu.VMEM((bn_t, C, ts), jnp.float32)],
        ),
        compiler_params=pltpu.CompilerParams(
            dimension_semantics=("parallel", "arbitrary")),
        cost_estimate=cost,
    )(x, params["w_img"], params["b_img"], params["gn_gamma"], params["gn_beta"],
      params["g_mat"], params["g_mat_t"], params["w_proj"], params["b_proj"])

    # Per-head attention weights laid out as (H, D, dh) / (H, dh, D) so the kernel
    # indexes heads on a leading axis (tiny wrapper reshapes, negligible cost).
    dh = D // num_heads

    def in_heads(w, b):
        return (w.reshape(D, num_heads, dh).transpose(1, 0, 2),
                b.reshape(1, num_heads, dh).transpose(1, 0, 2))

    wq_h, bq_h = in_heads(params["w_q"], params["b_q"])
    wk_h, bk_h = in_heads(params["w_k"], params["b_k"])
    wv_h, bv_h = in_heads(params["w_v"], params["b_v"])
    wo_h = params["w_o"].reshape(num_heads, dh, D)

    vmem = pl.BlockSpec(memory_space=pltpu.MemorySpace.VMEM)
    logits = pl.pallas_call(
        functools.partial(_head_kernel, num_heads=num_heads, pooling=pooling),
        out_shape=jax.ShapeDtypeStruct((B, NC), jnp.float32),
        in_specs=[vmem] * 23,
        out_specs=vmem,
    )(feats.reshape(B, N, F), proj.reshape(B, N, P),
      lens.reshape(B, 1, 1).astype(jnp.int32), params["pe"][:N],
      wq_h, bq_h, wk_h, bk_h, wv_h, bv_h, wo_h, params["b_o"],
      params["ln1_gamma"], params["ln1_beta"],
      params["w_ff1"], params["b_ff1"], params["w_ff2"], params["b_ff2"],
      params["ln2_gamma"], params["ln2_beta"],
      params["w_cls_feat"], params["w_cls_proj"], params["b_cls"])
    return logits


# ---------------------------------------------------------------------------
# Deterministic parameter init (PyTorch-Linear-style)
# ---------------------------------------------------------------------------
def init_params(key, *, in_channels, feature_dim, projection_dim, num_classes,
                num_heads, feedforward_dim, maxtime=32):
    assert feature_dim % NUM_GROUPS == 0
    D = projection_dim                       # transformer_dim with image_shape=(1,1)
    assert D % num_heads == 0

    def linear(k, fin, fout):
        kw, kb = jax.random.split(k)
        bound = 1.0 / math.sqrt(fin)
        w = jax.random.uniform(kw, (fin, fout), jnp.float32, -bound, bound)
        b = jax.random.uniform(kb, (1, fout), jnp.float32, -bound, bound)
        return w, b

    ks = jax.random.split(key, 9)
    w_img, b_img = linear(ks[0], in_channels, feature_dim)       # backbone stand-in
    w_proj, b_proj = linear(ks[1], feature_dim, projection_dim)
    w_q, b_q = linear(ks[2], D, D)
    w_k, b_k = linear(ks[3], D, D)
    w_v, b_v = linear(ks[4], D, D)
    w_o, b_o = linear(ks[5], D, D)
    w_ff1, b_ff1 = linear(ks[6], D, feedforward_dim)
    w_ff2, b_ff2 = linear(ks[7], feedforward_dim, D)
    w_cls, b_cls = linear(ks[8], feature_dim + projection_dim, num_classes)

    # ContinuousPosEncoding sin/cos buffer (exactly as in the PyTorch module).
    position = jnp.arange(maxtime, dtype=jnp.float32)[:, None]
    div_term = jnp.exp(jnp.arange(0, D, 2, dtype=jnp.float32)
                       * (-math.log(10000.0) / D))
    pe = jnp.zeros((maxtime, D), jnp.float32)
    pe = pe.at[:, 0::2].set(jnp.sin(position * div_term))
    pe = pe.at[:, 1::2].set(jnp.cos(position * div_term))

    # GroupNorm group-membership one-hot (and transpose) for in-kernel stats.
    g_idx = jnp.arange(feature_dim) // (feature_dim // NUM_GROUPS)
    g_mat = jax.nn.one_hot(g_idx, NUM_GROUPS, dtype=jnp.float32)

    return {
        "w_img": w_img, "b_img": b_img,
        "gn_gamma": jnp.ones((1, feature_dim), jnp.float32),
        "gn_beta": jnp.zeros((1, feature_dim), jnp.float32),
        "g_mat": g_mat, "g_mat_t": g_mat.T,
        "w_proj": w_proj, "b_proj": b_proj,
        "pe": pe,
        "w_q": w_q, "b_q": b_q, "w_k": w_k, "b_k": b_k,
        "w_v": w_v, "b_v": b_v, "w_o": w_o, "b_o": b_o,
        "ln1_gamma": jnp.ones((1, D), jnp.float32),
        "ln1_beta": jnp.zeros((1, D), jnp.float32),
        "w_ff1": w_ff1, "b_ff1": b_ff1, "w_ff2": w_ff2, "b_ff2": b_ff2,
        "ln2_gamma": jnp.ones((1, D), jnp.float32),
        "ln2_beta": jnp.zeros((1, D), jnp.float32),
        "w_cls_feat": w_cls[:feature_dim, :],
        "w_cls_proj": w_cls[feature_dim:, :],
        "b_cls": b_cls,
    }


if __name__ == "__main__":
    key = jax.random.PRNGKey(0)
    kp, kx = jax.random.split(key, 2)

    B, N, C, H, W = 2, 8, 4, 16, 16
    feature_dim, projection_dim = 64, 32
    num_heads, feedforward_dim, num_classes = 4, 64, 3

    params = init_params(kp, in_channels=C, feature_dim=feature_dim,
                         projection_dim=projection_dim, num_classes=num_classes,
                         num_heads=num_heads, feedforward_dim=feedforward_dim)

    images = jax.random.normal(kx, (B, N, C, H, W), jnp.float32)
    lens = jnp.array([N, N - 3], dtype=jnp.int32)   # per-sample valid lengths

    fwd = jax.jit(functools.partial(mip_forward, num_heads=num_heads, pooling="sum"))
    logits = fwd(images, lens, params)
    jax.block_until_ready(logits)

    assert logits.shape == (B, num_classes)
    print("KERNEL_OK")
</pallas_src>

<mosaic_0001>
module attributes {stable_mosaic.version = 11 : i64} {
  func.func @_backbone_kernel(%arg0: i32, %arg1: i32, %arg2: memref<8x4x256xf32, #tpu.memory_space<vmem>>, %arg3: memref<4x64xf32, #tpu.memory_space<vmem>>, %arg4: memref<1x64xf32, #tpu.memory_space<vmem>>, %arg5: memref<1x64xf32, #tpu.memory_space<vmem>>, %arg6: memref<1x64xf32, #tpu.memory_space<vmem>>, %arg7: memref<64x32xf32, #tpu.memory_space<vmem>>, %arg8: memref<32x64xf32, #tpu.memory_space<vmem>>, %arg9: memref<64x32xf32, #tpu.memory_space<vmem>>, %arg10: memref<1x32xf32, #tpu.memory_space<vmem>>, %arg11: memref<8x64xf32, #tpu.memory_space<vmem>>, %arg12: memref<8x32xf32, #tpu.memory_space<vmem>>, %arg13: memref<8x4x256xf32, #tpu.memory_space<vmem>>) attributes {dimension_semantics = [#tpu.dimension_semantics<parallel>, #tpu.dimension_semantics<arbitrary>], iteration_bounds = array<i64: 2, 1>, scalar_prefetch = 0 : i64, scratch_operands = 1 : i64, tpu.core_type = #tpu.core_type<tc>, window_params = [{transform_indices = @transform_0, window_bounds = array<i64: 8, 4, 256>}, {pipeline_mode = #tpu.pipeline_mode<synchronous>, transform_indices = @transform_1, window_bounds = array<i64: 4, 64>}, {pipeline_mode = #tpu.pipeline_mode<synchronous>, transform_indices = @transform_2, window_bounds = array<i64: 1, 64>}, {pipeline_mode = #tpu.pipeline_mode<synchronous>, transform_indices = @transform_3, window_bounds = array<i64: 1, 64>}, {pipeline_mode = #tpu.pipeline_mode<synchronous>, transform_indices = @transform_4, window_bounds = array<i64: 1, 64>}, {pipeline_mode = #tpu.pipeline_mode<synchronous>, transform_indices = @transform_5, window_bounds = array<i64: 64, 32>}, {pipeline_mode = #tpu.pipeline_mode<synchronous>, transform_indices = @transform_6, window_bounds = array<i64: 32, 64>}, {pipeline_mode = #tpu.pipeline_mode<synchronous>, transform_indices = @transform_7, window_bounds = array<i64: 64, 32>}, {pipeline_mode = #tpu.pipeline_mode<synchronous>, transform_indices = @transform_8, window_bounds = array<i64: 1, 32>}, {transform_indices = @transform_9, window_bounds = array<i64: 8, 64>}, {transform_indices = @transform_10, window_bounds = array<i64: 8, 32>}]} {
    %c0_i32 = arith.constant 0 : i32
    %0 = arith.cmpi eq, %arg1, %c0_i32 : i32
    %1 = arith.extui %0 : i1 to i32
    %c0_i32_0 = arith.constant 0 : i32
    %2 = arith.cmpi ne, %1, %c0_i32_0 : i32
    scf.if %2 {
      %cst = arith.constant 0.000000e+00 : f32
      %10 = vector.broadcast %cst : f32 to vector<8x4x256xf32>
      %c0_11 = arith.constant 0 : index
      %c0_12 = arith.constant 0 : index
      %c0_13 = arith.constant 0 : index
      %11 = vector.load %arg13[%c0_11, %c0_12, %c0_13] : memref<8x4x256xf32, #tpu.memory_space<vmem>>, vector<8x4x256xf32>
      tpu.vector_store %arg13[%c0_11, %c0_12, %c0_13], %10 {strides = array<i32>} : memref<8x4x256xf32, #tpu.memory_space<vmem>>, vector<8x4x256xf32>,
    } else {
    }
    %c0 = arith.constant 0 : index
    %c0_1 = arith.constant 0 : index
    %c0_2 = arith.constant 0 : index
    %3 = vector.load %arg13[%c0, %c0_1, %c0_2] : memref<8x4x256xf32, #tpu.memory_space<vmem>>, vector<8x4x256xf32>
    %c0_3 = arith.constant 0 : index
    %c0_4 = arith.constant 0 : index
    %c0_5 = arith.constant 0 : index
    %4 = vector.load %arg2[%c0_3, %c0_4, %c0_5] : memref<8x4x256xf32, #tpu.memory_space<vmem>>, vector<8x4x256xf32>
    %5 = arith.addf %3, %4 : vector<8x4x256xf32>
    %c0_6 = arith.constant 0 : index
    %c0_7 = arith.constant 0 : index
    %c0_8 = arith.constant 0 : index
    %6 = vector.load %arg13[%c0_6, %c0_7, %c0_8] : memref<8x4x256xf32, #tpu.memory_space<vmem>>, vector<8x4x256xf32>
    tpu.vector_store %arg13[%c0_6, %c0_7, %c0_8], %5 {strides = array<i32>} : memref<8x4x256xf32, #tpu.memory_space<vmem>>, vector<8x4x256xf32>,
    %c0_i32_9 = arith.constant 0 : i32
    %7 = arith.cmpi eq, %arg1, %c0_i32_9 : i32
    %8 = arith.extui %7 : i1 to i32
    %c0_i32_10 = arith.constant 0 : i32
    %9 = arith.cmpi ne, %8, %c0_i32_10 : i32
    scf.if %9 {
      %c0_11 = arith.constant 0 : index
      %c0_12 = arith.constant 0 : index
      %c0_13 = arith.constant 0 : index
      %10 = vector.load %arg13[%c0_11, %c0_12, %c0_13] : memref<8x4x256xf32, #tpu.memory_space<vmem>>, vector<8x4x256xf32>
      %cst = arith.constant dense<0.000000e+00> : vector<8x4xf32>
      %11 = vector.multi_reduction <add>, %10, %cst [2] : vector<8x4x256xf32> to vector<8x4xf32>
      %cst_14 = arith.constant 3.906250e-03 : f32
      %12 = vector.broadcast %cst_14 : f32 to vector<8x4xf32>
      %13 = arith.mulf %11, %12 : vector<8x4xf32>
      %c0_15 = arith.constant 0 : index
      %c0_16 = arith.constant 0 : index
      %14 = vector.load %arg3[%c0_15, %c0_16] : memref<4x64xf32, #tpu.memory_space<vmem>>, vector<4x64xf32>
      %cst_17 = arith.constant dense<0.000000e+00> : vector<8x64xf32>
      %15 = tpu.matmul %13, %14, %cst_17 {dimension_numbers = #tpu.dot_dimension_numbers<[1], [0], [0], [1], [0, 0, 1, 1], [], []>} : vector<8x4xf32>, vector<4x64xf32>, vector<8x64xf32> -> vector<8x64xf32>
      %c0_18 = arith.constant 0 : index
      %c0_19 = arith.constant 0 : index
      %16 = vector.load %arg4[%c0_18, %c0_19] : memref<1x64xf32, #tpu.memory_space<vmem>>, vector<1x64xf32>
      %17 = vector.broadcast %16 : vector<1x64xf32> to vector<8x64xf32>
      %18 = arith.addf %15, %17 : vector<8x64xf32>
      %c0_20 = arith.constant 0 : index
      %c0_21 = arith.constant 0 : index
      %19 = vector.load %arg7[%c0_20, %c0_21] : memref<64x32xf32, #tpu.memory_space<vmem>>, vector<64x32xf32>
      %c0_22 = arith.constant 0 : index
      %c0_23 = arith.constant 0 : index
      %20 = vector.load %arg8[%c0_22, %c0_23] : memref<32x64xf32, #tpu.memory_space<vmem>>, vector<32x64xf32>
      %cst_24 = arith.constant dense<0.000000e+00> : vector<8x32xf32>
      %21 = tpu.matmul %18, %19, %cst_24 {dimension_numbers = #tpu.dot_dimension_numbers<[1], [0], [0], [1], [0, 0, 1, 1], [], []>} : vector<8x64xf32>, vector<64x32xf32>, vector<8x32xf32> -> vector<8x32xf32>
      %cst_25 = arith.constant 5.000000e-01 : f32
      %22 = vector.broadcast %cst_25 : f32 to vector<8x32xf32>
      %23 = arith.mulf %21, %22 : vector<8x32xf32>
      %24 = arith.mulf %18, %18 : vector<8x64xf32>
      %cst_26 = arith.constant dense<0.000000e+00> : vector<8x32xf32>
      %25 = tpu.matmul %24, %19, %cst_26 {dimension_numbers = #tpu.dot_dimension_numbers<[1], [0], [0], [1], [0, 0, 1, 1], [], []>} : vector<8x64xf32>, vector<64x32xf32>, vector<8x32xf32> -> vector<8x32xf32>
      %cst_27 = arith.constant 5.000000e-01 : f32
      %26 = vector.broadcast %cst_27 : f32 to vector<8x32xf32>
      %27 = arith.mulf %25, %26 : vector<8x32xf32>
      %28 = arith.mulf %23, %23 : vector<8x32xf32>
      %29 = arith.subf %27, %28 : vector<8x32xf32>
      %cst_28 = arith.constant dense<0.000000e+00> : vector<8x64xf32>
      %30 = tpu.matmul %23, %20, %cst_28 {dimension_numbers = #tpu.dot_dimension_numbers<[1], [0], [0], [1], [0, 0, 1, 1], [], []>} : vector<8x32xf32>, vector<32x64xf32>, vector<8x64xf32> -> vector<8x64xf32>
      %cst_29 = arith.constant dense<0.000000e+00> : vector<8x64xf32>
      %31 = tpu.matmul %29, %20, %cst_29 {dimension_numbers = #tpu.dot_dimension_numbers<[1], [0], [0], [1], [0, 0, 1, 1], [], []>} : vector<8x32xf32>, vector<32x64xf32>, vector<8x64xf32> -> vector<8x64xf32>
      %32 = arith.subf %18, %30 : vector<8x64xf32>
      %cst_30 = arith.constant 9.99999974E-6 : f32
      %33 = vector.broadcast %cst_30 : f32 to vector<8x64xf32>
      %34 = arith.addf %31, %33 : vector<8x64xf32>
      %35 = math.rsqrt %34 : vector<8x64xf32>
      %36 = arith.mulf %32, %35 : vector<8x64xf32>
      %c0_31 = arith.constant 0 : index
      %c0_32 = arith.constant 0 : index
      %37 = vector.load %arg5[%c0_31, %c0_32] : memref<1x64xf32, #tpu.memory_space<vmem>>, vector<1x64xf32>
      %38 = vector.broadcast %37 : vector<1x64xf32> to vector<8x64xf32>
      %39 = arith.mulf %36, %38 : vector<8x64xf32>
      %c0_33 = arith.constant 0 : index
      %c0_34 = arith.constant 0 : index
      %40 = vector.load %arg6[%c0_33, %c0_34] : memref<1x64xf32, #tpu.memory_space<vmem>>, vector<1x64xf32>
      %41 = vector.broadcast %40 : vector<1x64xf32> to vector<8x64xf32>
      %42 = arith.addf %39, %41 : vector<8x64xf32>
      %cst_35 = arith.constant 0.000000e+00 : f32
      %43 = vector.broadcast %cst_35 : f32 to vector<8x64xf32>
      %44 = arith.maximumf %42, %43 : vector<8x64xf32>
      %c0_36 = arith.constant 0 : index
      %c0_37 = arith.constant 0 : index
      %45 = vector.load %arg11[%c0_36, %c0_37] : memref<8x64xf32, #tpu.memory_space<vmem>>, vector<8x64xf32>
      tpu.vector_store %arg11[%c0_36, %c0_37], %44 {strides = array<i32>} : memref<8x64xf32, #tpu.memory_space<vmem>>, vector<8x64xf32>,
      %c0_38 = arith.constant 0 : index
      %c0_39 = arith.constant 0 : index
      %46 = vector.load %arg9[%c0_38, %c0_39] : memref<64x32xf32, #tpu.memory_space<vmem>>, vector<64x32xf32>
      %cst_40 = arith.constant dense<0.000000e+00> : vector<8x32xf32>
      %47 = tpu.matmul %44, %46, %cst_40 {dimension_numbers = #tpu.dot_dimension_numbers<[1], [0], [0], [1], [0, 0, 1, 1], [], []>} : vector<8x64xf32>, vector<64x32xf32>, vector<8x32xf32> -> vector<8x32xf32>
      %c0_41 = arith.constant 0 : index
      %c0_42 = arith.constant 0 : index
      %48 = vector.load %arg10[%c0_41, %c0_42] : memref<1x32xf32, #tpu.memory_space<vmem>>, vector<1x32xf32>
      %49 = vector.broadcast %48 : vector<1x32xf32> to vector<8x32xf32>
      %50 = arith.addf %47, %49 : vector<8x32xf32>
      %c0_43 = arith.constant 0 : index
      %c0_44 = arith.constant 0 : index
      %51 = vector.load %arg12[%c0_43, %c0_44] : memref<8x32xf32, #tpu.memory_space<vmem>>, vector<8x32xf32>
      tpu.vector_store %arg12[%c0_43, %c0_44], %50 {strides = array<i32>} : memref<8x32xf32, #tpu.memory_space<vmem>>, vector<8x32xf32>,
    } else {
    }
    return
  }
  func.func @transform_0(%arg0: i32, %arg1: i32) -> (i32, i32, i32) {
    %c0_i32 = arith.constant 0 : i32
    %c0_i32_0 = arith.constant 0 : i32
    return %arg0, %c0_i32, %arg1 : i32, i32, i32
  }
  func.func @transform_1(%arg0: i32, %arg1: i32) -> (i32, i32) {
    %c0_i32 = arith.constant 0 : i32
    %c0_i32_0 = arith.constant 0 : i32
    %c0_i32_1 = arith.constant 0 : i32
    return %c0_i32, %c0_i32_0 : i32, i32
  }
  func.func @transform_2(%arg0: i32, %arg1: i32) -> (i32, i32) {
    %c0_i32 = arith.constant 0 : i32
    %c0_i32_0 = arith.constant 0 : i32
    %c0_i32_1 = arith.constant 0 : i32
    return %c0_i32, %c0_i32_0 : i32, i32
  }
  func.func @transform_3(%arg0: i32, %arg1: i32) -> (i32, i32) {
    %c0_i32 = arith.constant 0 : i32
    %c0_i32_0 = arith.constant 0 : i32
    %c0_i32_1 = arith.constant 0 : i32
    return %c0_i32, %c0_i32_0 : i32, i32
  }
  func.func @transform_4(%arg0: i32, %arg1: i32) -> (i32, i32) {
    %c0_i32 = arith.constant 0 : i32
    %c0_i32_0 = arith.constant 0 : i32
    %c0_i32_1 = arith.constant 0 : i32
    return %c0_i32, %c0_i32_0 : i32, i32
  }
  func.func @transform_5(%arg0: i32, %arg1: i32) -> (i32, i32) {
    %c0_i32 = arith.constant 0 : i32
    %c0_i32_0 = arith.constant 0 : i32
    %c0_i32_1 = arith.constant 0 : i32
    return %c0_i32, %c0_i32_0 : i32, i32
  }
  func.func @transform_6(%arg0: i32, %arg1: i32) -> (i32, i32) {
    %c0_i32 = arith.constant 0 : i32
    %c0_i32_0 = arith.constant 0 : i32
    %c0_i32_1 = arith.constant 0 : i32
    return %c0_i32, %c0_i32_0 : i32, i32
  }
  func.func @transform_7(%arg0: i32, %arg1: i32) -> (i32, i32) {
    %c0_i32 = arith.constant 0 : i32
    %c0_i32_0 = arith.constant 0 : i32
    %c0_i32_1 = arith.constant 0 : i32
    return %c0_i32, %c0_i32_0 : i32, i32
  }
  func.func @transform_8(%arg0: i32, %arg1: i32) -> (i32, i32) {
    %c0_i32 = arith.constant 0 : i32
    %c0_i32_0 = arith.constant 0 : i32
    %c0_i32_1 = arith.constant 0 : i32
    return %c0_i32, %c0_i32_0 : i32, i32
  }
  func.func @transform_9(%arg0: i32, %arg1: i32) -> (i32, i32) {
    %c0_i32 = arith.constant 0 : i32
    %c0_i32_0 = arith.constant 0 : i32
    return %arg0, %c0_i32 : i32, i32
  }
  func.func @transform_10(%arg0: i32, %arg1: i32) -> (i32, i32) {
    %c0_i32 = arith.constant 0 : i32
    %c0_i32_0 = arith.constant 0 : i32
    return %arg0, %c0_i32 : i32, i32
  }
}

module attributes {stable_mosaic.version = 11 : i64} {
  func.func @_head_kernel(%arg0: memref<2x8x64xf32, #tpu.memory_space<vmem>>, %arg1: memref<2x8x32xf32, #tpu.memory_space<vmem>>, %arg2: memref<2x1x1xi32, #tpu.memory_space<vmem>>, %arg3: memref<8x32xf32, #tpu.memory_space<vmem>>, %arg4: memref<4x32x8xf32, #tpu.memory_space<vmem>>, %arg5: memref<4x1x8xf32, #tpu.memory_space<vmem>>, %arg6: memref<4x32x8xf32, #tpu.memory_space<vmem>>, %arg7: memref<4x1x8xf32, #tpu.memory_space<vmem>>, %arg8: memref<4x32x8xf32, #tpu.memory_space<vmem>>, %arg9: memref<4x1x8xf32, #tpu.memory_space<vmem>>, %arg10: memref<4x8x32xf32, #tpu.memory_space<vmem>>, %arg11: memref<1x32xf32, #tpu.memory_space<vmem>>, %arg12: memref<1x32xf32, #tpu.memory_space<vmem>>, %arg13: memref<1x32xf32, #tpu.memory_space<vmem>>, %arg14: memref<32x64xf32, #tpu.memory_space<vmem>>, %arg15: memref<1x64xf32, #tpu.memory_space<vmem>>, %arg16: memref<64x32xf32, #tpu.memory_space<vmem>>, %arg17: memref<1x32xf32, #tpu.memory_space<vmem>>, %arg18: memref<1x32xf32, #tpu.memory_space<vmem>>, %arg19: memref<1x32xf32, #tpu.memory_space<vmem>>, %arg20: memref<64x3xf32, #tpu.memory_space<vmem>>, %arg21: memref<32x3xf32, #tpu.memory_space<vmem>>, %arg22: memref<1x3xf32, #tpu.memory_space<vmem>>, %arg23: memref<2x3xf32, #tpu.memory_space<vmem>>) attributes {dimension_semantics = [], scalar_prefetch = 0 : i64, scratch_operands = 0 : i64, tpu.core_type = #tpu.core_type<tc>} {
    %c0 = arith.constant 0 : index
    %c0_0 = arith.constant 0 : index
    %c0_1 = arith.constant 0 : index
    %0 = vector.load %arg0[%c0, %c0_0, %c0_1] : memref<2x8x64xf32, #tpu.memory_space<vmem>>, vector<2x8x64xf32>
    %c0_2 = arith.constant 0 : index
    %c0_3 = arith.constant 0 : index
    %c0_4 = arith.constant 0 : index
    %1 = vector.load %arg1[%c0_2, %c0_3, %c0_4] : memref<2x8x32xf32, #tpu.memory_space<vmem>>, vector<2x8x32xf32>
    %c0_5 = arith.constant 0 : index
    %c0_6 = arith.constant 0 : index
    %c0_7 = arith.constant 0 : index
    %2 = vector.load %arg2[%c0_5, %c0_6, %c0_7] : memref<2x1x1xi32, #tpu.memory_space<vmem>>, vector<2x1x1xi32>
    %3 = tpu.iota {dimensions = array<i32: 1>} : vector<2x8x1xi32>
    %4 = vector.broadcast %2 : vector<2x1x1xi32> to vector<2x8x1xi32>
    %5 = arith.cmpi slt, %3, %4 : vector<2x8x1xi32>
    %6 = arith.extui %5 : vector<2x8x1xi1> to vector<2x8x1xi32>
    %7 = arith.sitofp %6 : vector<2x8x1xi32> to vector<2x8x1xf32>
    %c0_8 = arith.constant 0 : index
    %c0_9 = arith.constant 0 : index
    %8 = vector.load %arg3[%c0_8, %c0_9] : memref<8x32xf32, #tpu.memory_space<vmem>>, vector<8x32xf32>
    %9 = vector.shape_cast %8 : vector<8x32xf32> to vector<1x8x32xf32>
    %10 = vector.broadcast %9 : vector<1x8x32xf32> to vector<2x8x32xf32>
    %11 = vector.broadcast %7 : vector<2x8x1xf32> to vector<2x8x32xf32>
    %12 = arith.mulf %10, %11 : vector<2x8x32xf32>
    %13 = arith.addf %1, %12 : vector<2x8x32xf32>
    %14 = vector.shape_cast %13 : vector<2x8x32xf32> to vector<16x32xf32>
    %cst = arith.constant 0.000000e+00 : f32
    %15 = vector.broadcast %cst : f32 to vector<16x32xf32>
    %c0_10 = arith.constant 0 : index
    %c0_11 = arith.constant 0 : index
    %c0_12 = arith.constant 0 : index
    %16 = vector.load %arg4[%c0_10, %c0_11, %c0_12] : memref<4x32x8xf32, #tpu.memory_space<vmem>>, vector<1x32x8xf32>
    %17 = vector.shape_cast %16 : vector<1x32x8xf32> to vector<32x8xf32>
    %cst_13 = arith.constant dense<0.000000e+00> : vector<16x8xf32>
    %18 = tpu.matmul %14, %17, %cst_13 {dimension_numbers = #tpu.dot_dimension_numbers<[1], [0], [0], [1], [0, 0, 1, 1], [], []>} : vector<16x32xf32>, vector<32x8xf32>, vector<16x8xf32> -> vector<16x8xf32>
    %c0_14 = arith.constant 0 : index
    %c0_15 = arith.constant 0 : index
    %c0_16 = arith.constant 0 : index
    %19 = vector.load %arg5[%c0_14, %c0_15, %c0_16] : memref<4x1x8xf32, #tpu.memory_space<vmem>>, vector<1x1x8xf32>
    %20 = vector.shape_cast %19 : vector<1x1x8xf32> to vector<1x8xf32>
    %21 = vector.broadcast %20 : vector<1x8xf32> to vector<16x8xf32>
    %22 = arith.addf %18, %21 : vector<16x8xf32>
    %23 = vector.shape_cast %22 : vector<16x8xf32> to vector<2x8x8xf32>
    %c0_17 = arith.constant 0 : index
    %c0_18 = arith.constant 0 : index
    %c0_19 = arith.constant 0 : index
    %24 = vector.load %arg6[%c0_17, %c0_18, %c0_19] : memref<4x32x8xf32, #tpu.memory_space<vmem>>, vector<1x32x8xf32>
    %25 = vector.shape_cast %24 : vector<1x32x8xf32> to vector<32x8xf32>
    %cst_20 = arith.constant dense<0.000000e+00> : vector<16x8xf32>
    %26 = tpu.matmul %14, %25, %cst_20 {dimension_numbers = #tpu.dot_dimension_numbers<[1], [0], [0], [1], [0, 0, 1, 1], [], []>} : vector<16x32xf32>, vector<32x8xf32>, vector<16x8xf32> -> vector<16x8xf32>
    %c0_21 = arith.constant 0 : index
    %c0_22 = arith.constant 0 : index
    %c0_23 = arith.constant 0 : index
    %27 = vector.load %arg7[%c0_21, %c0_22, %c0_23] : memref<4x1x8xf32, #tpu.memory_space<vmem>>, vector<1x1x8xf32>
    %28 = vector.shape_cast %27 : vector<1x1x8xf32> to vector<1x8xf32>
    %29 = vector.broadcast %28 : vector<1x8xf32> to vector<16x8xf32>
    %30 = arith.addf %26, %29 : vector<16x8xf32>
    %31 = vector.shape_cast %30 : vector<16x8xf32> to vector<2x8x8xf32>
    %c0_24 = arith.constant 0 : index
    %c0_25 = arith.constant 0 : index
    %c0_26 = arith.constant 0 : index
    %32 = vector.load %arg8[%c0_24, %c0_25, %c0_26] : memref<4x32x8xf32, #tpu.memory_space<vmem>>, vector<1x32x8xf32>
    %33 = vector.shape_cast %32 : vector<1x32x8xf32> to vector<32x8xf32>
    %cst_27 = arith.constant dense<0.000000e+00> : vector<16x8xf32>
    %34 = tpu.matmul %14, %33, %cst_27 {dimension_numbers = #tpu.dot_dimension_numbers<[1], [0], [0], [1], [0, 0, 1, 1], [], []>} : vector<16x32xf32>, vector<32x8xf32>, vector<16x8xf32> -> vector<16x8xf32>
    %c0_28 = arith.constant 0 : index
    %c0_29 = arith.constant 0 : index
    %c0_30 = arith.constant 0 : index
    %35 = vector.load %arg9[%c0_28, %c0_29, %c0_30] : memref<4x1x8xf32, #tpu.memory_space<vmem>>, vector<1x1x8xf32>
    %36 = vector.shape_cast %35 : vector<1x1x8xf32> to vector<1x8xf32>
    %37 = vector.broadcast %36 : vector<1x8xf32> to vector<16x8xf32>
    %38 = arith.addf %34, %37 : vector<16x8xf32>
    %39 = vector.shape_cast %38 : vector<16x8xf32> to vector<2x8x8xf32>
    "tpu.trace_start"() <{level = 10 : i32, message = "bqd,bkd->bqk"}> : () -> ()
    %cst_31 = arith.constant dense<0.000000e+00> : vector<2x8x8xf32>
    %40 = tpu.matmul %23, %31, %cst_31 {dimension_numbers = #tpu.dot_dimension_numbers<[2], [2], [1], [1], [0, 0, 0, 1, 1, 1], [0], [0]>} : vector<2x8x8xf32>, vector<2x8x8xf32>, vector<2x8x8xf32> -> vector<2x8x8xf32>
    "tpu.trace_stop"() : () -> ()
    %cst_32 = arith.constant 0.353553385 : f32
    %41 = vector.broadcast %cst_32 : f32 to vector<2x8x8xf32>
    %42 = arith.mulf %40, %41 : vector<2x8x8xf32>
    %cst_33 = arith.constant dense<0xFF800000> : vector<2x8xf32>
    %43 = vector.multi_reduction <maximumf>, %42, %cst_33 [2] : vector<2x8x8xf32> to vector<2x8xf32>
    %44 = vector.shape_cast %43 : vector<2x8xf32> to vector<2x8x1xf32>
    %45 = vector.broadcast %44 : vector<2x8x1xf32> to vector<2x8x8xf32>
    %46 = arith.subf %42, %45 : vector<2x8x8xf32>
    %47 = math.exp %46 : vector<2x8x8xf32>
    %cst_34 = arith.constant dense<0.000000e+00> : vector<2x8xf32>
    %48 = vector.multi_reduction <add>, %47, %cst_34 [2] : vector<2x8x8xf32> to vector<2x8xf32>
    %49 = vector.shape_cast %48 : vector<2x8xf32> to vector<2x8x1xf32>
    %50 = vector.broadcast %49 : vector<2x8x1xf32> to vector<2x8x8xf32>
    %51 = arith.divf %47, %50 : vector<2x8x8xf32>
    "tpu.trace_start"() <{level = 10 : i32, message = "bqk,bkd->bqd"}> : () -> ()
    %cst_35 = arith.constant dense<0.000000e+00> : vector<2x8x8xf32>
    %52 = tpu.matmul %51, %39, %cst_35 {dimension_numbers = #tpu.dot_dimension_numbers<[2], [1], [1], [2], [0, 0, 0, 1, 1, 2], [0], [0]>} : vector<2x8x8xf32>, vector<2x8x8xf32>, vector<2x8x8xf32> -> vector<2x8x8xf32>
    "tpu.trace_stop"() : () -> ()
    %53 = vector.shape_cast %52 : vector<2x8x8xf32> to vector<16x8xf32>
    %c0_36 = arith.constant 0 : index
    %c0_37 = arith.constant 0 : index
    %c0_38 = arith.constant 0 : index
    %54 = vector.load %arg10[%c0_36, %c0_37, %c0_38] : memref<4x8x32xf32, #tpu.memory_space<vmem>>, vector<1x8x32xf32>
    %55 = vector.shape_cast %54 : vector<1x8x32xf32> to vector<8x32xf32>
    %cst_39 = arith.constant dense<0.000000e+00> : vector<16x32xf32>
    %56 = tpu.matmul %53, %55, %cst_39 {dimension_numbers = #tpu.dot_dimension_numbers<[1], [0], [0], [1], [0, 0, 1, 1], [], []>} : vector<16x8xf32>, vector<8x32xf32>, vector<16x32xf32> -> vector<16x32xf32>
    %57 = arith.addf %15, %56 : vector<16x32xf32>
    %c1 = arith.constant 1 : index
    %c0_40 = arith.constant 0 : index
    %c0_41 = arith.constant 0 : index
    %58 = vector.load %arg4[%c1, %c0_40, %c0_41] : memref<4x32x8xf32, #tpu.memory_space<vmem>>, vector<1x32x8xf32>
    %59 = vector.shape_cast %58 : vector<1x32x8xf32> to vector<32x8xf32>
    %cst_42 = arith.constant dense<0.000000e+00> : vector<16x8xf32>
    %60 = tpu.matmul %14, %59, %cst_42 {dimension_numbers = #tpu.dot_dimension_numbers<[1], [0], [0], [1], [0, 0, 1, 1], [], []>} : vector<16x32xf32>, vector<32x8xf32>, vector<16x8xf32> -> vector<16x8xf32>
    %c1_43 = arith.constant 1 : index
    %c0_44 = arith.constant 0 : index
    %c0_45 = arith.constant 0 : index
    %61 = vector.load %arg5[%c1_43, %c0_44, %c0_45] : memref<4x1x8xf32, #tpu.memory_space<vmem>>, vector<1x1x8xf32>
    %62 = vector.shape_cast %61 : vector<1x1x8xf32> to vector<1x8xf32>
    %63 = vector.broadcast %62 : vector<1x8xf32> to vector<16x8xf32>
    %64 = arith.addf %60, %63 : vector<16x8xf32>
    %65 = vector.shape_cast %64 : vector<16x8xf32> to vector<2x8x8xf32>
    %c1_46 = arith.constant 1 : index
    %c0_47 = arith.constant 0 : index
    %c0_48 = arith.constant 0 : index
    %66 = vector.load %arg6[%c1_46, %c0_47, %c0_48] : memref<4x32x8xf32, #tpu.memory_space<vmem>>, vector<1x32x8xf32>
    %67 = vector.shape_cast %66 : vector<1x32x8xf32> to vector<32x8xf32>
    %cst_49 = arith.constant dense<0.000000e+00> : vector<16x8xf32>
    %68 = tpu.matmul %14, %67, %cst_49 {dimension_numbers = #tpu.dot_dimension_numbers<[1], [0], [0], [1], [0, 0, 1, 1], [], []>} : vector<16x32xf32>, vector<32x8xf32>, vector<16x8xf32> -> vector<16x8xf32>
    %c1_50 = arith.constant 1 : index
    %c0_51 = arith.constant 0 : index
    %c0_52 = arith.constant 0 : index
    %69 = vector.load %arg7[%c1_50, %c0_51, %c0_52] : memref<4x1x8xf32, #tpu.memory_space<vmem>>, vector<1x1x8xf32>
    %70 = vector.shape_cast %69 : vector<1x1x8xf32> to vector<1x8xf32>
    %71 = vector.broadcast %70 : vector<1x8xf32> to vector<16x8xf32>
    %72 = arith.addf %68, %71 : vector<16x8xf32>
    %73 = vector.shape_cast %72 : vector<16x8xf32> to vector<2x8x8xf32>
    %c1_53 = arith.constant 1 : index
    %c0_54 = arith.constant 0 : index
    %c0_55 = arith.constant 0 : index
    %74 = vector.load %arg8[%c1_53, %c0_54, %c0_55] : memref<4x32x8xf32, #tpu.memory_space<vmem>>, vector<1x32x8xf32>
    %75 = vector.shape_cast %74 : vector<1x32x8xf32> to vector<32x8xf32>
    %cst_56 = arith.constant dense<0.000000e+00> : vector<16x8xf32>
    %76 = tpu.matmul %14, %75, %cst_56 {dimension_numbers = #tpu.dot_dimension_numbers<[1], [0], [0], [1], [0, 0, 1, 1], [], []>} : vector<16x32xf32>, vector<32x8xf32>, vector<16x8xf32> -> vector<16x8xf32>
    %c1_57 = arith.constant 1 : index
    %c0_58 = arith.constant 0 : index
    %c0_59 = arith.constant 0 : index
    %77 = vector.load %arg9[%c1_57, %c0_58, %c0_59] : memref<4x1x8xf32, #tpu.memory_space<vmem>>, vector<1x1x8xf32>
    %78 = vector.shape_cast %77 : vector<1x1x8xf32> to vector<1x8xf32>
    %79 = vector.broadcast %78 : vector<1x8xf32> to vector<16x8xf32>
    %80 = arith.addf %76, %79 : vector<16x8xf32>
    %81 = vector.shape_cast %80 : vector<16x8xf32> to vector<2x8x8xf32>
    "tpu.trace_start"() <{level = 10 : i32, message = "bqd,bkd->bqk"}> : () -> ()
    %cst_60 = arith.constant dense<0.000000e+00> : vector<2x8x8xf32>
    %82 = tpu.matmul %65, %73, %cst_60 {dimension_numbers = #tpu.dot_dimension_numbers<[2], [2], [1], [1], [0, 0, 0, 1, 1, 1], [0], [0]>} : vector<2x8x8xf32>, vector<2x8x8xf32>, vector<2x8x8xf32> -> vector<2x8x8xf32>
    "tpu.trace_stop"() : () -> ()
    %cst_61 = arith.constant 0.353553385 : f32
    %83 = vector.broadcast %cst_61 : f32 to vector<2x8x8xf32>
    %84 = arith.mulf %82, %83 : vector<2x8x8xf32>
    %cst_62 = arith.constant dense<0xFF800000> : vector<2x8xf32>
    %85 = vector.multi_reduction <maximumf>, %84, %cst_62 [2] : vector<2x8x8xf32> to vector<2x8xf32>
    %86 = vector.shape_cast %85 : vector<2x8xf32> to vector<2x8x1xf32>
    %87 = vector.broadcast %86 : vector<2x8x1xf32> to vector<2x8x8xf32>
    %88 = arith.subf %84, %87 : vector<2x8x8xf32>
    %89 = math.exp %88 : vector<2x8x8xf32>
    %cst_63 = arith.constant dense<0.000000e+00> : vector<2x8xf32>
    %90 = vector.multi_reduction <add>, %89, %cst_63 [2] : vector<2x8x8xf32> to vector<2x8xf32>
    %91 = vector.shape_cast %90 : vector<2x8xf32> to vector<2x8x1xf32>
    %92 = vector.broadcast %91 : vector<2x8x1xf32> to vector<2x8x8xf32>
    %93 = arith.divf %89, %92 : vector<2x8x8xf32>
    "tpu.trace_start"() <{level = 10 : i32, message = "bqk,bkd->bqd"}> : () -> ()
    %cst_64 = arith.constant dense<0.000000e+00> : vector<2x8x8xf32>
    %94 = tpu.matmul %93, %81, %cst_64 {dimension_numbers = #tpu.dot_dimension_numbers<[2], [1], [1], [2], [0, 0, 0, 1, 1, 2], [0], [0]>} : vector<2x8x8xf32>, vector<2x8x8xf32>, vector<2x8x8xf32> -> vector<2x8x8xf32>
    "tpu.trace_stop"() : () -> ()
    %95 = vector.shape_cast %94 : vector<2x8x8xf32> to vector<16x8xf32>
    %c1_65 = arith.constant 1 : index
    %c0_66 = arith.constant 0 : index
    %c0_67 = arith.constant 0 : index
    %96 = vector.load %arg10[%c1_65, %c0_66, %c0_67] : memref<4x8x32xf32, #tpu.memory_space<vmem>>, vector<1x8x32xf32>
    %97 = vector.shape_cast %96 : vector<1x8x32xf32> to vector<8x32xf32>
    %cst_68 = arith.constant dense<0.000000e+00> : vector<16x32xf32>
    %98 = tpu.matmul %95, %97, %cst_68 {dimension_numbers = #tpu.dot_dimension_numbers<[1], [0], [0], [1], [0, 0, 1, 1], [], []>} : vector<16x8xf32>, vector<8x32xf32>, vector<16x32xf32> -> vector<16x32xf32>
    %99 = arith.addf %57, %98 : vector<16x32xf32>
    %c2 = arith.constant 2 : index
    %c0_69 = arith.constant 0 : index
    %c0_70 = arith.constant 0 : index
    %100 = vector.load %arg4[%c2, %c0_69, %c0_70] : memref<4x32x8xf32, #tpu.memory_space<vmem>>, vector<1x32x8xf32>
    %101 = vector.shape_cast %100 : vector<1x32x8xf32> to vector<32x8xf32>
    %cst_71 = arith.constant dense<0.000000e+00> : vector<16x8xf32>
    %102 = tpu.matmul %14, %101, %cst_71 {dimension_numbers = #tpu.dot_dimension_numbers<[1], [0], [0], [1], [0, 0, 1, 1], [], []>} : vector<16x32xf32>, vector<32x8xf32>, vector<16x8xf32> -> vector<16x8xf32>
    %c2_72 = arith.constant 2 : index
    %c0_73 = arith.constant 0 : index
    %c0_74 = arith.constant 0 : index
    %103 = vector.load %arg5[%c2_72, %c0_73, %c0_74] : memref<4x1x8xf32, #tpu.memory_space<vmem>>, vector<1x1x8xf32>
    %104 = vector.shape_cast %103 : vector<1x1x8xf32> to vector<1x8xf32>
    %105 = vector.broadcast %104 : vector<1x8xf32> to vector<16x8xf32>
    %106 = arith.addf %102, %105 : vector<16x8xf32>
    %107 = vector.shape_cast %106 : vector<16x8xf32> to vector<2x8x8xf32>
    %c2_75 = arith.constant 2 : index
    %c0_76 = arith.constant 0 : index
    %c0_77 = arith.constant 0 : index
    %108 = vector.load %arg6[%c2_75, %c0_76, %c0_77] : memref<4x32x8xf32, #tpu.memory_space<vmem>>, vector<1x32x8xf32>
    %109 = vector.shape_cast %108 : vector<1x32x8xf32> to vector<32x8xf32>
    %cst_78 = arith.constant dense<0.000000e+00> : vector<16x8xf32>
    %110 = tpu.matmul %14, %109, %cst_78 {dimension_numbers = #tpu.dot_dimension_numbers<[1], [0], [0], [1], [0, 0, 1, 1], [], []>} : vector<16x32xf32>, vector<32x8xf32>, vector<16x8xf32> -> vector<16x8xf32>
    %c2_79 = arith.constant 2 : index
    %c0_80 = arith.constant 0 : index
    %c0_81 = arith.constant 0 : index
    %111 = vector.load %arg7[%c2_79, %c0_80, %c0_81] : memref<4x1x8xf32, #tpu.memory_space<vmem>>, vector<1x1x8xf32>
    %112 = vector.shape_cast %111 : vector<1x1x8xf32> to vector<1x8xf32>
    %113 = vector.broadcast %112 : vector<1x8xf32> to vector<16x8xf32>
    %114 = arith.addf %110, %113 : vector<16x8xf32>
    %115 = vector.shape_cast %114 : vector<16x8xf32> to vector<2x8x8xf32>
    %c2_82 = arith.constant 2 : index
    %c0_83 = arith.constant 0 : index
    %c0_84 = arith.constant 0 : index
    %116 = vector.load %arg8[%c2_82, %c0_83, %c0_84] : memref<4x32x8xf32, #tpu.memory_space<vmem>>, vector<1x32x8xf32>
    %117 = vector.shape_cast %116 : vector<1x32x8xf32> to vector<32x8xf32>
    %cst_85 = arith.constant dense<0.000000e+00> : vector<16x8xf32>
    %118 = tpu.matmul %14, %117, %cst_85 {dimension_numbers = #tpu.dot_dimension_numbers<[1], [0], [0], [1], [0, 0, 1, 1], [], []>} : vector<16x32xf32>, vector<32x8xf32>, vector<16x8xf32> -> vector<16x8xf32>
    %c2_86 = arith.constant 2 : index
    %c0_87 = arith.constant 0 : index
    %c0_88 = arith.constant 0 : index
    %119 = vector.load %arg9[%c2_86, %c0_87, %c0_88] : memref<4x1x8xf32, #tpu.memory_space<vmem>>, vector<1x1x8xf32>
    %120 = vector.shape_cast %119 : vector<1x1x8xf32> to vector<1x8xf32>
    %121 = vector.broadcast %120 : vector<1x8xf32> to vector<16x8xf32>
    %122 = arith.addf %118, %121 : vector<16x8xf32>
    %123 = vector.shape_cast %122 : vector<16x8xf32> to vector<2x8x8xf32>
    "tpu.trace_start"() <{level = 10 : i32, message = "bqd,bkd->bqk"}> : () -> ()
    %cst_89 = arith.constant dense<0.000000e+00> : vector<2x8x8xf32>
    %124 = tpu.matmul %107, %115, %cst_89 {dimension_numbers = #tpu.dot_dimension_numbers<[2], [2], [1], [1], [0, 0, 0, 1, 1, 1], [0], [0]>} : vector<2x8x8xf32>, vector<2x8x8xf32>, vector<2x8x8xf32> -> vector<2x8x8xf32>
    "tpu.trace_stop"() : () -> ()
    %cst_90 = arith.constant 0.353553385 : f32
    %125 = vector.broadcast %cst_90 : f32 to vector<2x8x8xf32>
    %126 = arith.mulf %124, %125 : vector<2x8x8xf32>
    %cst_91 = arith.constant dense<0xFF800000> : vector<2x8xf32>
    %127 = vector.multi_reduction <maximumf>, %126, %cst_91 [2] : vector<2x8x8xf32> to vector<2x8xf32>
    %128 = vector.shape_cast %127 : vector<2x8xf32> to vector<2x8x1xf32>
    %129 = vector.broadcast %128 : vector<2x8x1xf32> to vector<2x8x8xf32>
    %130 = arith.subf %126, %129 : vector<2x8x8xf32>
    %131 = math.exp %130 : vector<2x8x8xf32>
    %cst_92 = arith.constant dense<0.000000e+00> : vector<2x8xf32>
    %132 = vector.multi_reduction <add>, %131, %cst_92 [2] : vector<2x8x8xf32> to vector<2x8xf32>
    %133 = vector.shape_cast %132 : vector<2x8xf32> to vector<2x8x1xf32>
    %134 = vector.broadcast %133 : vector<2x8x1xf32> to vector<2x8x8xf32>
    %135 = arith.divf %131, %134 : vector<2x8x8xf32>
    "tpu.trace_start"() <{level = 10 : i32, message = "bqk,bkd->bqd"}> : () -> ()
    %cst_93 = arith.constant dense<0.000000e+00> : vector<2x8x8xf32>
    %136 = tpu.matmul %135, %123, %cst_93 {dimension_numbers = #tpu.dot_dimension_numbers<[2], [1], [1], [2], [0, 0, 0, 1, 1, 2], [0], [0]>} : vector<2x8x8xf32>, vector<2x8x8xf32>, vector<2x8x8xf32> -> vector<2x8x8xf32>
    "tpu.trace_stop"() : () -> ()
    %137 = vector.shape_cast %136 : vector<2x8x8xf32> to vector<16x8xf32>
    %c2_94 = arith.constant 2 : index
    %c0_95 = arith.constant 0 : index
    %c0_96 = arith.constant 0 : index
    %138 = vector.load %arg10[%c2_94, %c0_95, %c0_96] : memref<4x8x32xf32, #tpu.memory_space<vmem>>, vector<1x8x32xf32>
    %139 = vector.shape_cast %138 : vector<1x8x32xf32> to vector<8x32xf32>
    %cst_97 = arith.constant dense<0.000000e+00> : vector<16x32xf32>
    %140 = tpu.matmul %137, %139, %cst_97 {dimension_numbers = #tpu.dot_dimension_numbers<[1], [0], [0], [1], [0, 0, 1, 1], [], []>} : vector<16x8xf32>, vector<8x32xf32>, vector<16x32xf32> -> vector<16x32xf32>
    %141 = arith.addf %99, %140 : vector<16x32xf32>
    %c3 = arith.constant 3 : index
    %c0_98 = arith.constant 0 : index
    %c0_99 = arith.constant 0 : index
    %142 = vector.load %arg4[%c3, %c0_98, %c0_99] : memref<4x32x8xf32, #tpu.memory_space<vmem>>, vector<1x32x8xf32>
    %143 = vector.shape_cast %142 : vector<1x32x8xf32> to vector<32x8xf32>
    %cst_100 = arith.constant dense<0.000000e+00> : vector<16x8xf32>
    %144 = tpu.matmul %14, %143, %cst_100 {dimension_numbers = #tpu.dot_dimension_numbers<[1], [0], [0], [1], [0, 0, 1, 1], [], []>} : vector<16x32xf32>, vector<32x8xf32>, vector<16x8xf32> -> vector<16x8xf32>
    %c3_101 = arith.constant 3 : index
    %c0_102 = arith.constant 0 : index
    %c0_103 = arith.constant 0 : index
    %145 = vector.load %arg5[%c3_101, %c0_102, %c0_103] : memref<4x1x8xf32, #tpu.memory_space<vmem>>, vector<1x1x8xf32>
    %146 = vector.shape_cast %145 : vector<1x1x8xf32> to vector<1x8xf32>
    %147 = vector.broadcast %146 : vector<1x8xf32> to vector<16x8xf32>
    %148 = arith.addf %144, %147 : vector<16x8xf32>
    %149 = vector.shape_cast %148 : vector<16x8xf32> to vector<2x8x8xf32>
    %c3_104 = arith.constant 3 : index
    %c0_105 = arith.constant 0 : index
    %c0_106 = arith.constant 0 : index
    %150 = vector.load %arg6[%c3_104, %c0_105, %c0_106] : memref<4x32x8xf32, #tpu.memory_space<vmem>>, vector<1x32x8xf32>
    %151 = vector.shape_cast %150 : vector<1x32x8xf32> to vector<32x8xf32>
    %cst_107 = arith.constant dense<0.000000e+00> : vector<16x8xf32>
    %152 = tpu.matmul %14, %151, %cst_107 {dimension_numbers = #tpu.dot_dimension_numbers<[1], [0], [0], [1], [0, 0, 1, 1], [], []>} : vector<16x32xf32>, vector<32x8xf32>, vector<16x8xf32> -> vector<16x8xf32>
    %c3_108 = arith.constant 3 : index
    %c0_109 = arith.constant 0 : index
    %c0_110 = arith.constant 0 : index
    %153 = vector.load %arg7[%c3_108, %c0_109, %c0_110] : memref<4x1x8xf32, #tpu.memory_space<vmem>>, vector<1x1x8xf32>
    %154 = vector.shape_cast %153 : vector<1x1x8xf32> to vector<1x8xf32>
    %155 = vector.broadcast %154 : vector<1x8xf32> to vector<16x8xf32>
    %156 = arith.addf %152, %155 : vector<16x8xf32>
    %157 = vector.shape_cast %156 : vector<16x8xf32> to vector<2x8x8xf32>
    %c3_111 = arith.constant 3 : index
    %c0_112 = arith.constant 0 : index
    %c0_113 = arith.constant 0 : index
    %158 = vector.load %arg8[%c3_111, %c0_112, %c0_113] : memref<4x32x8xf32, #tpu.memory_space<vmem>>, vector<1x32x8xf32>
    %159 = vector.shape_cast %158 : vector<1x32x8xf32> to vector<32x8xf32>
    %cst_114 = arith.constant dense<0.000000e+00> : vector<16x8xf32>
    %160 = tpu.matmul %14, %159, %cst_114 {dimension_numbers = #tpu.dot_dimension_numbers<[1], [0], [0], [1], [0, 0, 1, 1], [], []>} : vector<16x32xf32>, vector<32x8xf32>, vector<16x8xf32> -> vector<16x8xf32>
    %c3_115 = arith.constant 3 : index
    %c0_116 = arith.constant 0 : index
    %c0_117 = arith.constant 0 : index
    %161 = vector.load %arg9[%c3_115, %c0_116, %c0_117] : memref<4x1x8xf32, #tpu.memory_space<vmem>>, vector<1x1x8xf32>
    %162 = vector.shape_cast %161 : vector<1x1x8xf32> to vector<1x8xf32>
    %163 = vector.broadcast %162 : vector<1x8xf32> to vector<16x8xf32>
    %164 = arith.addf %160, %163 : vector<16x8xf32>
    %165 = vector.shape_cast %164 : vector<16x8xf32> to vector<2x8x8xf32>
    "tpu.trace_start"() <{level = 10 : i32, message = "bqd,bkd->bqk"}> : () -> ()
    %cst_118 = arith.constant dense<0.000000e+00> : vector<2x8x8xf32>
    %166 = tpu.matmul %149, %157, %cst_118 {dimension_numbers = #tpu.dot_dimension_numbers<[2], [2], [1], [1], [0, 0, 0, 1, 1, 1], [0], [0]>} : vector<2x8x8xf32>, vector<2x8x8xf32>, vector<2x8x8xf32> -> vector<2x8x8xf32>
    "tpu.trace_stop"() : () -> ()
    %cst_119 = arith.constant 0.353553385 : f32
    %167 = vector.broadcast %cst_119 : f32 to vector<2x8x8xf32>
    %168 = arith.mulf %166, %167 : vector<2x8x8xf32>
    %cst_120 = arith.constant dense<0xFF800000> : vector<2x8xf32>
    %169 = vector.multi_reduction <maximumf>, %168, %cst_120 [2] : vector<2x8x8xf32> to vector<2x8xf32>
    %170 = vector.shape_cast %169 : vector<2x8xf32> to vector<2x8x1xf32>
    %171 = vector.broadcast %170 : vector<2x8x1xf32> to vector<2x8x8xf32>
    %172 = arith.subf %168, %171 : vector<2x8x8xf32>
    %173 = math.exp %172 : vector<2x8x8xf32>
    %cst_121 = arith.constant dense<0.000000e+00> : vector<2x8xf32>
    %174 = vector.multi_reduction <add>, %173, %cst_121 [2] : vector<2x8x8xf32> to vector<2x8xf32>
    %175 = vector.shape_cast %174 : vector<2x8xf32> to vector<2x8x1xf32>
    %176 = vector.broadcast %175 : vector<2x8x1xf32> to vector<2x8x8xf32>
    %177 = arith.divf %173, %176 : vector<2x8x8xf32>
    "tpu.trace_start"() <{level = 10 : i32, message = "bqk,bkd->bqd"}> : () -> ()
    %cst_122 = arith.constant dense<0.000000e+00> : vector<2x8x8xf32>
    %178 = tpu.matmul %177, %165, %cst_122 {dimension_numbers = #tpu.dot_dimension_numbers<[2], [1], [1], [2], [0, 0, 0, 1, 1, 2], [0], [0]>} : vector<2x8x8xf32>, vector<2x8x8xf32>, vector<2x8x8xf32> -> vector<2x8x8xf32>
    "tpu.trace_stop"() : () -> ()
    %179 = vector.shape_cast %178 : vector<2x8x8xf32> to vector<16x8xf32>
    %c3_123 = arith.constant 3 : index
    %c0_124 = arith.constant 0 : index
    %c0_125 = arith.constant 0 : index
    %180 = vector.load %arg10[%c3_123, %c0_124, %c0_125] : memref<4x8x32xf32, #tpu.memory_space<vmem>>, vector<1x8x32xf32>
    %181 = vector.shape_cast %180 : vector<1x8x32xf32> to vector<8x32xf32>
    %cst_126 = arith.constant dense<0.000000e+00> : vector<16x32xf32>
    %182 = tpu.matmul %179, %181, %cst_126 {dimension_numbers = #tpu.dot_dimension_numbers<[1], [0], [0], [1], [0, 0, 1, 1], [], []>} : vector<16x8xf32>, vector<8x32xf32>, vector<16x32xf32> -> vector<16x32xf32>
    %183 = arith.addf %141, %182 : vector<16x32xf32>
    %c0_127 = arith.constant 0 : index
    %c0_128 = arith.constant 0 : index
    %184 = vector.load %arg11[%c0_127, %c0_128] : memref<1x32xf32, #tpu.memory_space<vmem>>, vector<1x32xf32>
    %185 = vector.broadcast %184 : vector<1x32xf32> to vector<16x32xf32>
    %186 = arith.addf %183, %185 : vector<16x32xf32>
    %187 = arith.addf %14, %186 : vector<16x32xf32>
    %c0_129 = arith.constant 0 : index
    %c0_130 = arith.constant 0 : index
    %188 = vector.load %arg12[%c0_129, %c0_130] : memref<1x32xf32, #tpu.memory_space<vmem>>, vector<1x32xf32>
    %c0_131 = arith.constant 0 : index
    %c0_132 = arith.constant 0 : index
    %189 = vector.load %arg13[%c0_131, %c0_132] : memref<1x32xf32, #tpu.memory_space<vmem>>, vector<1x32xf32>
    %cst_133 = arith.constant dense<0.000000e+00> : vector<16xf32>
    %190 = vector.multi_reduction <add>, %187, %cst_133 [1] : vector<16x32xf32> to vector<16xf32>
    %191 = vector.shape_cast %190 : vector<16xf32> to vector<16x1xf32>
    %cst_134 = arith.constant 3.200000e+01 : f32
    %192 = vector.broadcast %cst_134 : f32 to vector<16x1xf32>
    %193 = arith.divf %191, %192 : vector<16x1xf32>
    %194 = vector.broadcast %193 : vector<16x1xf32> to vector<16x32xf32>
    %195 = arith.subf %187, %194 : vector<16x32xf32>
    %196 = arith.mulf %195, %195 : vector<16x32xf32>
    %cst_135 = arith.constant dense<0.000000e+00> : vector<16xf32>
    %197 = vector.multi_reduction <add>, %196, %cst_135 [1] : vector<16x32xf32> to vector<16xf32>
    %198 = vector.shape_cast %197 : vector<16xf32> to vector<16x1xf32>
    %cst_136 = arith.constant 3.200000e+01 : f32
    %199 = vector.broadcast %cst_136 : f32 to vector<16x1xf32>
    %200 = arith.divf %198, %199 : vector<16x1xf32>
    %201 = vector.broadcast %193 : vector<16x1xf32> to vector<16x32xf32>
    %202 = arith.subf %187, %201 : vector<16x32xf32>
    %cst_137 = arith.constant 9.99999974E-6 : f32
    %203 = vector.broadcast %cst_137 : f32 to vector<16x1xf32>
    %204 = arith.addf %200, %203 : vector<16x1xf32>
    %205 = math.rsqrt %204 : vector<16x1xf32>
    %206 = vector.broadcast %205 : vector<16x1xf32> to vector<16x32xf32>
    %207 = arith.mulf %202, %206 : vector<16x32xf32>
    %208 = vector.broadcast %188 : vector<1x32xf32> to vector<16x32xf32>
    %209 = arith.mulf %207, %208 : vector<16x32xf32>
    %210 = vector.broadcast %189 : vector<1x32xf32> to vector<16x32xf32>
    %211 = arith.addf %209, %210 : vector<16x32xf32>
    %c0_138 = arith.constant 0 : index
    %c0_139 = arith.constant 0 : index
    %212 = vector.load %arg14[%c0_138, %c0_139] : memref<32x64xf32, #tpu.memory_space<vmem>>, vector<32x64xf32>
    %cst_140 = arith.constant dense<0.000000e+00> : vector<16x64xf32>
    %213 = tpu.matmul %211, %212, %cst_140 {dimension_numbers = #tpu.dot_dimension_numbers<[1], [0], [0], [1], [0, 0, 1, 1], [], []>} : vector<16x32xf32>, vector<32x64xf32>, vector<16x64xf32> -> vector<16x64xf32>
    %c0_141 = arith.constant 0 : index
    %c0_142 = arith.constant 0 : index
    %214 = vector.load %arg15[%c0_141, %c0_142] : memref<1x64xf32, #tpu.memory_space<vmem>>, vector<1x64xf32>
    %215 = vector.broadcast %214 : vector<1x64xf32> to vector<16x64xf32>
    %216 = arith.addf %213, %215 : vector<16x64xf32>
    %cst_143 = arith.constant 0.000000e+00 : f32
    %217 = vector.broadcast %cst_143 : f32 to vector<16x64xf32>
    %218 = arith.maximumf %216, %217 : vector<16x64xf32>
    %c0_144 = arith.constant 0 : index
    %c0_145 = arith.constant 0 : index
    %219 = vector.load %arg16[%c0_144, %c0_145] : memref<64x32xf32, #tpu.memory_space<vmem>>, vector<64x32xf32>
    %cst_146 = arith.constant dense<0.000000e+00> : vector<16x32xf32>
    %220 = tpu.matmul %218, %219, %cst_146 {dimension_numbers = #tpu.dot_dimension_numbers<[1], [0], [0], [1], [0, 0, 1, 1], [], []>} : vector<16x64xf32>, vector<64x32xf32>, vector<16x32xf32> -> vector<16x32xf32>
    %c0_147 = arith.constant 0 : index
    %c0_148 = arith.constant 0 : index
    %221 = vector.load %arg17[%c0_147, %c0_148] : memref<1x32xf32, #tpu.memory_space<vmem>>, vector<1x32xf32>
    %222 = vector.broadcast %221 : vector<1x32xf32> to vector<16x32xf32>
    %223 = arith.addf %220, %222 : vector<16x32xf32>
    %224 = arith.addf %211, %223 : vector<16x32xf32>
    %c0_149 = arith.constant 0 : index
    %c0_150 = arith.constant 0 : index
    %225 = vector.load %arg18[%c0_149, %c0_150] : memref<1x32xf32, #tpu.memory_space<vmem>>, vector<1x32xf32>
    %c0_151 = arith.constant 0 : index
    %c0_152 = arith.constant 0 : index
    %226 = vector.load %arg19[%c0_151, %c0_152] : memref<1x32xf32, #tpu.memory_space<vmem>>, vector<1x32xf32>
    %cst_153 = arith.constant dense<0.000000e+00> : vector<16xf32>
    %227 = vector.multi_reduction <add>, %224, %cst_153 [1] : vector<16x32xf32> to vector<16xf32>
    %228 = vector.shape_cast %227 : vector<16xf32> to vector<16x1xf32>
    %cst_154 = arith.constant 3.200000e+01 : f32
    %229 = vector.broadcast %cst_154 : f32 to vector<16x1xf32>
    %230 = arith.divf %228, %229 : vector<16x1xf32>
    %231 = vector.broadcast %230 : vector<16x1xf32> to vector<16x32xf32>
    %232 = arith.subf %224, %231 : vector<16x32xf32>
    %233 = arith.mulf %232, %232 : vector<16x32xf32>
    %cst_155 = arith.constant dense<0.000000e+00> : vector<16xf32>
    %234 = vector.multi_reduction <add>, %233, %cst_155 [1] : vector<16x32xf32> to vector<16xf32>
    %235 = vector.shape_cast %234 : vector<16xf32> to vector<16x1xf32>
    %cst_156 = arith.constant 3.200000e+01 : f32
    %236 = vector.broadcast %cst_156 : f32 to vector<16x1xf32>
    %237 = arith.divf %235, %236 : vector<16x1xf32>
    %238 = vector.broadcast %230 : vector<16x1xf32> to vector<16x32xf32>
    %239 = arith.subf %224, %238 : vector<16x32xf32>
    %cst_157 = arith.constant 9.99999974E-6 : f32
    %240 = vector.broadcast %cst_157 : f32 to vector<16x1xf32>
    %241 = arith.addf %237, %240 : vector<16x1xf32>
    %242 = math.rsqrt %241 : vector<16x1xf32>
    %243 = vector.broadcast %242 : vector<16x1xf32> to vector<16x32xf32>
    %244 = arith.mulf %239, %243 : vector<16x32xf32>
    %245 = vector.broadcast %225 : vector<1x32xf32> to vector<16x32xf32>
    %246 = arith.mulf %244, %245 : vector<16x32xf32>
    %247 = vector.broadcast %226 : vector<1x32xf32> to vector<16x32xf32>
    %248 = arith.addf %246, %247 : vector<16x32xf32>
    %249 = vector.shape_cast %248 : vector<16x32xf32> to vector<2x8x32xf32>
    %250 = vector.broadcast %7 : vector<2x8x1xf32> to vector<2x8x64xf32>
    %251 = arith.mulf %0, %250 : vector<2x8x64xf32>
    %cst_158 = arith.constant dense<0.000000e+00> : vector<2x64xf32>
    %252 = vector.multi_reduction <add>, %251, %cst_158 [1] : vector<2x8x64xf32> to vector<2x64xf32>
    %253 = vector.broadcast %7 : vector<2x8x1xf32> to vector<2x8x32xf32>
    %254 = arith.mulf %249, %253 : vector<2x8x32xf32>
    %cst_159 = arith.constant dense<0.000000e+00> : vector<2x32xf32>
    %255 = vector.multi_reduction <add>, %254, %cst_159 [1] : vector<2x8x32xf32> to vector<2x32xf32>
    %c0_160 = arith.constant 0 : index
    %c0_161 = arith.constant 0 : index
    %256 = vector.load %arg20[%c0_160, %c0_161] : memref<64x3xf32, #tpu.memory_space<vmem>>, vector<64x3xf32>
    %cst_162 = arith.constant dense<0.000000e+00> : vector<2x3xf32>
    %257 = tpu.matmul %252, %256, %cst_162 {dimension_numbers = #tpu.dot_dimension_numbers<[1], [0], [0], [1], [0, 0, 1, 1], [], []>} : vector<2x64xf32>, vector<64x3xf32>, vector<2x3xf32> -> vector<2x3xf32>
    %c0_163 = arith.constant 0 : index
    %c0_164 = arith.constant 0 : index
    %258 = vector.load %arg21[%c0_163, %c0_164] : memref<32x3xf32, #tpu.memory_space<vmem>>, vector<32x3xf32>
    %cst_165 = arith.constant dense<0.000000e+00> : vector<2x3xf32>
    %259 = tpu.matmul %255, %258, %cst_165 {dimension_numbers = #tpu.dot_dimension_numbers<[1], [0], [0], [1], [0, 0, 1, 1], [], []>} : vector<2x32xf32>, vector<32x3xf32>, vector<2x3xf32> -> vector<2x3xf32>
    %260 = arith.addf %257, %259 : vector<2x3xf32>
    %c0_166 = arith.constant 0 : index
    %c0_167 = arith.constant 0 : index
    %261 = vector.load %arg22[%c0_166, %c0_167] : memref<1x3xf32, #tpu.memory_space<vmem>>, vector<1x3xf32>
    %262 = vector.broadcast %261 : vector<1x3xf32> to vector<2x3xf32>
    %263 = arith.addf %260, %262 : vector<2x3xf32>
    %c0_168 = arith.constant 0 : index
    %c0_169 = arith.constant 0 : index
    %264 = vector.load %arg23[%c0_168, %c0_169] : memref<2x3xf32, #tpu.memory_space<vmem>>, vector<2x3xf32>
    tpu.vector_store %arg23[%c0_168, %c0_169], %263 {strides = array<i32>} : memref<2x3xf32, #tpu.memory_space<vmem>>, vector<2x3xf32>,
    return
  }
}

</mosaic_0001>

<bundles_post_ra>
// kernel: mip_forward.2
= control target key start
LH: loop header
LB: loop body
LE: loop exit
PB: predicated region body
PF: predicated region fallthrough
CT: control target
= control target key end

     0   :  { %s1018_s13 = smov 0   ;;  %s1020_s14 = smov 0   ;;  %s1158_s0 = inlined_call_operand.vmem [shape: f32[16,4,256], index: 0, kind: input, shape index: {}]   ;;  %s1159_s1 = inlined_call_operand.vmem [shape: f32[4,64], index: 1, kind: input, shape index: {}]   ;;  %s1160_s2 = inlined_call_operand.vmem [shape: f32[1,64], index: 2, kind: input, shape index: {}]   ;;  %s1161_s3 = inlined_call_operand.vmem [shape: f32[1,64], index: 3, kind: input, shape index: {}]   ;;  %s1162_s4 = inlined_call_operand.vmem [shape: f32[1,64], index: 4, kind: input, shape index: {}]   ;;  %s1163_s5 = inlined_call_operand.vmem [shape: f32[64,32], index: 5, kind: input, shape index: {}]   ;;  %s1164_s6 = inlined_call_operand.vmem [shape: f32[32,64], index: 6, kind: input, shape index: {}]   ;;  %s1165_s7 = inlined_call_operand.vmem [shape: f32[64,32], index: 7, kind: input, shape index: {}]   ;;  %s1166_s8 = inlined_call_operand.vmem [shape: f32[1,32], index: 8, kind: input, shape index: {}]   ;;  %s1167_s9 = inlined_call_operand.vmem [shape: f32[16,64], index: 9, kind: output, shape index: {0}]   ;;  %s1168_s10 = inlined_call_operand.vmem [shape: f32[16,32], index: 10, kind: output, shape index: {1}]  }
   0x1   :  { %s1022_s15 = smov 0  }
   0x2 LB: > { %s33_s16 = sadd.s32 1, %s957_s14  ;;  %p893_p0 = scmp.ge.s32.totalorder %s961_s15, 1  ;;  %s961_s15 = sphi %s1022_s15, %s21_s15   ;;  %s957_s14 = sphi %s1020_s14, %s1170_s14   ;;  %s953_s13 = sphi %s1018_s13, %s1169_s13  }
   0x3   : > { %p35_p1 = scmp.ge.s32.totalorder %s33_s16, 2  ;;  %p336_p2 = scmp.lt.s32.totalorder %s961_s15, 3 }
   0x5   : > { %s1172_s16 = smov (%p35_p1, %s33_s16), 0  ;;  %p337_p3 = pnand %p893_p0, %p336_p2 }
   0x6   : > { %s894_s17 = sshll.u32 (!%p337_p3), %s953_s13, 3  ;;  %p394_p5 = scmp.lt.s32.totalorder (!%p337_p3), %s953_s13, 1 }
   0x7   : > { %340 = sbr.rel (%p337_p3) target bundleno = 721 (0x2d1), region = 56  ;;  %p384_p4 = scmp.lt.s32.totalorder (!%p337_p3), %s894_s17, 15 }
   0xc   : > { %s1174_s17 = smov (!%p384_p4, %s894_s17), 15  ;;  %vm508_vm0 = vcmask 1043456   ;;  %v557_v48 = vld [vmem:[%s1159_s1] sm:$0xf]  ;;  %v627_v49 = vld [vmem:[%s1163_s5 + $0x38] sm:$0xff]  ;;  %v626_v50 = vld [vmem:[%s1163_s5 + $0x30] sm:$0xff]  ;;  %v570_v57 = vlaneseq }
   0xd   : > { %s908_s18 = sshll.u32 %s1174_s17, 3  ;;  %899 = vmatpush.msk.msra.mxu0 %vm508_vm0, %v557_v48  ;;  %644 = vmatpush.msra.mxu1 %v627_v49  ;;  %v625_v51 = vld [vmem:[%s1163_s5 + $0x28] sm:$0xff]  ;;  %v624_v52 = vld [vmem:[%s1163_s5 + $0x20] sm:$0xff]  ;;  %v623_v53 = vld [vmem:[%s1163_s5 + $0x18] sm:$0xff]  ;;  %vm580_vm1 = vcmask 1041409   ;;  %vm582_vm2 = vcmask 1042434  }
   0xe   : > { %s391_s21 = scalar_lea.vmem %s1158_s0, %s908_s18  ;;  %669 = vmatpush.msra.mxu2 %v627_v49  ;;  %v622_v55 = vld [vmem:[%s1163_s5 + $0x10] sm:$0xff]  ;;  %v571_v58 = vand.u32 127, %v570_v57  ;;  %vm584_vm3 = vcmask 1043459   ;;  %vm586_vm4 = vcmask 1044484   ;;  %vm588_vm5 = vcmask 1045509   ;;  %v755_v48 = vld [vmem:[%s1165_s7] sm:$0xff] }
   0xf   : > { %v422_v0 = vld [vmem:[%s391_s21] sm:$0xff]  ;;  %v424_v1 = vld [vmem:[%s391_s21 + $0x10] sm:$0xff]  ;;  %v423_v2 = vld [vmem:[%s391_s21 + $0x8] sm:$0xff]  ;;  %645 = vmatpush.msra.mxu1 %v626_v50  ;;  %vm590_vm6 = vcmask 1046534   ;;  %vm592_vm7 = vcmask 1047559   ;;  %vm594_vm8 = vcmask 31744  }
  0x10   : > { %465 = vst [vmem:[#allocation1] ss:$2 sm:$0xff] %v422_v0  ;;  %v425_v3 = vld [vmem:[%s391_s21 + $0x18] sm:$0xff]  ;;  %v426_v4 = vld [vmem:[%s391_s21 + $0x20] sm:$0xff]  ;;  %v428_v5 = vld [vmem:[%s391_s21 + $0x30] sm:$0xff]  ;;  %670 = vmatpush.msra.mxu2 %v626_v50  ;;  %vm632_vm9 = vcmask 523264  }
  0x11   : > { %473 = vst [vmem:[#allocation1 + $0x20] ss:$2 sm:$0xff] %v424_v1  ;;  %v427_v10 = vld [vmem:[%s391_s21 + $0x28] sm:$0xff]  ;;  %v429_v16 = vld [vmem:[%s391_s21 + $0x38] sm:$0xff]  ;;  %646 = vmatpush.msra.mxu1 %v625_v51  ;;  %vm684_vm10 = vcmask 261120   ;;  %s1176_s13 = smov (!%p394_p5, %s953_s13), 1 }
  0x12   : > { %469 = vst [vmem:[#allocation1 + $0x10] ss:$2 sm:$0xff] %v423_v2  ;;  %671 = vmatpush.msra.mxu2 %v625_v51  ;;  %s897_s22 = sshll.u32 %s1176_s13, 3 }
  0x13   : > { %477 = vst [vmem:[#allocation1 + $0x30] ss:$2 sm:$0xff] %v425_v3  ;;  %647 = vmatpush.msra.mxu1 %v624_v52  ;;  %s397_s25 = scalar_lea.vmem %s1167_s9, %s897_s22  ;;  %s401_s30 = scalar_lea.vmem %s1168_s10, %s897_s22 }
  0x14   : > { %672 = vmatpush.msra.mxu2 %v624_v52 }
  0x15   : > { %648 = vmatpush.msra.mxu1 %v623_v53 }
  0x16   : > { %673 = vmatpush.msra.mxu2 %v623_v53 }
  0x17   : > { %v466_v6 = vld.sshfl [vmem:[#allocation1] sm:$0xff pattern:$0x75316420]  ;;  %v467_v7 = vld.sshfl [vmem:[#allocation1 + $0x8] sm:$0xff pattern:$0x75316420]  ;;  %649 = vmatpush.msra.mxu1 %v622_v55 }
  0x18   : > { %v509_v8 = vsel %vm508_vm0, %v466_v6, 0.0  ;;  %v510_v9 = vsel %vm508_vm0, %v467_v7, 0.0  ;;  %480 = vst [vmem:[#allocation1] ss:$2 sm:$0xff] %v426_v4  ;;  %674 = vmatpush.msra.mxu2 %v622_v55 }
  0x19   : > { %v511_v11 = vadd.f32 %v510_v9, %v509_v8  ;;  %v474_v12 = vld.sshfl [vmem:[#allocation1 + $0x20] sm:$0xff pattern:$0x75316420]  ;;  %v475_v13 = vld.sshfl [vmem:[#allocation1 + $0x28] sm:$0xff pattern:$0x75316420] }
  0x1a   : > { %v519_v14 = vsel %vm508_vm0, %v474_v12, 0.0  ;;  %v520_v15 = vsel %vm508_vm0, %v475_v13, 0.0  ;;  %486 = vst [vmem:[#allocation1 + $0x20] ss:$2 sm:$0xff] %v428_v5 }
  0x1b   : > { %512 = vadd.xlane.f32.xlu0 %v511_v11  ;;  %v521_v17 = vadd.f32 %v520_v15, %v519_v14  ;;  %v470_v18 = vld.sshfl [vmem:[#allocation1 + $0x10] sm:$0xff pattern:$0x75316420]  ;;  %v471_v19 = vld.sshfl [vmem:[#allocation1 + $0x18] sm:$0xff pattern:$0x75316420] }
  0x1c   : > { %483 = vst [vmem:[#allocation1 + $0x10] ss:$2 sm:$0xff] %v427_v10  ;;  %v514_v20 = vsel %vm508_vm0, %v470_v18, 0.0  ;;  %v515_v21 = vsel %vm508_vm0, %v471_v19, 0.0 }
  0x1d   : > { %522 = vadd.xlane.f32.xlu1 %v521_v17  ;;  %v478_v22 = vld.sshfl [vmem:[#allocation1 + $0x30] sm:$0xff pattern:$0x75316420]  ;;  %v479_v23 = vld.sshfl [vmem:[#allocation1 + $0x38] sm:$0xff pattern:$0x75316420]  ;;  %v516_v26 = vadd.f32 %v515_v21, %v514_v20 }
  0x1e   : > { %489 = vst [vmem:[#allocation1 + $0x30] ss:$2 sm:$0xff] %v429_v16  ;;  %v524_v24 = vsel %vm508_vm0, %v478_v22, 0.0  ;;  %v525_v25 = vsel %vm508_vm0, %v479_v23, 0.0 }
  0x1f   : > { %v481_v27 = vld.sshfl [vmem:[#allocation1] sm:$0xff pattern:$0x75316420]  ;;  %v482_v28 = vld.sshfl [vmem:[#allocation1 + $0x8] sm:$0xff pattern:$0x75316420]  ;;  %v526_v32 = vadd.f32 %v525_v25, %v524_v24 }
  0x20   : > { %v529_v29 = vsel %vm508_vm0, %v481_v27, 0.0  ;;  %v530_v30 = vsel %vm508_vm0, %v482_v28, 0.0  ;;  %v621_v24 = vld [vmem:[%s1163_s5 + $0x8] sm:$0xff]  ;;  %v620_v25 = vld [vmem:[%s1163_s5] sm:$0xff]  ;;  %v630_v27 = vld [vmem:[%s1164_s6 + $0x10] sm:$0xff] }
  0x21   : > { %v531_v31 = vadd.f32 %v530_v30, %v529_v29  ;;  %v487_v33 = vld.sshfl [vmem:[#allocation1 + $0x20] sm:$0xff pattern:$0x75316420]  ;;  %v488_v34 = vld.sshfl [vmem:[#allocation1 + $0x28] sm:$0xff pattern:$0x75316420]  ;;  %650 = vmatpush.msra.mxu1 %v621_v24  ;;  %675 = vmatpush.msra.mxu2 %v621_v24 }
  0x22   : > { %v539_v39 = vsel %vm508_vm0, %v487_v33, 0.0  ;;  %v540_v40 = vsel %vm508_vm0, %v488_v34, 0.0  ;;  %v933_v28 = vld [vmem:[%s1160_s2] ss:$0 sm:$0xff] }
  0x23   : > { %517 = vadd.xlane.f32.xlu0 %v516_v26  ;;  %532 = vadd.xlane.f32.xlu2 %v531_v31  ;;  %v484_v35 = vld.sshfl [vmem:[#allocation1 + $0x10] sm:$0xff pattern:$0x75316420]  ;;  %v485_v36 = vld.sshfl [vmem:[#allocation1 + $0x18] sm:$0xff pattern:$0x75316420]  ;;  %v541_v46 = vadd.f32 %v540_v40, %v539_v39 }
  0x24   : > { %v534_v37 = vsel %vm508_vm0, %v484_v35, 0.0  ;;  %v535_v38 = vsel %vm508_vm0, %v485_v36, 0.0  ;;  %651 = vmatpush.msra.mxu1 %v620_v25  ;;  %676 = vmatpush.msra.mxu2 %v620_v25  ;;  %v631_v26 = vld [vmem:[%s1164_s6 + $0x18] sm:$0xff]  ;;  %v628_v33 = vld [vmem:[%s1164_s6] sm:$0xff] }
  0x25   : > { %527 = vadd.xlane.f32.xlu1 %v526_v32  ;;  %v490_v41 = vld.sshfl [vmem:[#allocation1 + $0x30] sm:$0xff pattern:$0x75316420]  ;;  %v491_v42 = vld.sshfl [vmem:[#allocation1 + $0x38] sm:$0xff pattern:$0x75316420]  ;;  %v536_v45 = vadd.f32 %v535_v38, %v534_v37  ;;  %700 = vmatpush.msrb.mxu0 %v631_v26 }
  0x26   : > { %v544_v43 = vsel %vm508_vm0, %v490_v41, 0.0  ;;  %v545_v44 = vsel %vm508_vm0, %v491_v42, 0.0  ;;  %v629_v32 = vld [vmem:[%s1164_s6 + $0x8] sm:$0xff]  ;;  %v762_v40 = vld [vmem:[%s1165_s7 + $0x38] sm:$0xff]  ;;  %v761_v41 = vld [vmem:[%s1165_s7 + $0x30] sm:$0xff] }
  0x27   : > { %v546_v47 = vadd.f32 %v545_v44, %v544_v43  ;;  %701 = vmatpush.msrb.mxu0 %v630_v27  ;;  %778 = vmatpush.msra.mxu3 %v762_v40  ;;  %v760_v42 = vld [vmem:[%s1165_s7 + $0x28] sm:$0xff]  ;;  %v759_v43 = vld [vmem:[%s1165_s7 + $0x20] sm:$0xff]  ;;  %v758_v44 = vld [vmem:[%s1165_s7 + $0x18] sm:$0xff] }
  0x29   : > { %702 = vmatpush.msrb.mxu0 %v629_v32  ;;  %779 = vmatpush.msra.mxu3 %v761_v41 }
  0x2b   : > { %537 = vadd.xlane.f32.xlu2 %v536_v45  ;;  %542 = vadd.xlane.f32.xlu0 %v541_v46  ;;  %v757_v45 = vld [vmem:[%s1165_s7 + $0x10] sm:$0xff]  ;;  %v756_v46 = vld [vmem:[%s1165_s7 + $0x8] sm:$0xff] }
  0x2c   : > { %703 = vmatpush.msrb.mxu0 %v628_v33  ;;  %780 = vmatpush.msra.mxu3 %v760_v42 }
  0x2d   : > { %547 = vadd.xlane.f32.xlu1 %v546_v47 }
  0x2e   : > { %781 = vmatpush.msra.mxu3 %v759_v43 }
  0x30   : > { %782 = vmatpush.msra.mxu3 %v758_v44 }
  0x32   : > { %783 = vmatpush.msra.mxu3 %v757_v45 }
  0x34   : > { %784 = vmatpush.msra.mxu3 %v756_v46 }
  0x36   : > { %785 = vmatpush.msra.mxu3 %v755_v48 }
  0x8e   : > { %v513_v54 = vpop.xlane.xlu0 %512 }
  0x8f   : > { %v549_v59 = vmul.f32 0.00390625, %v513_v54 }
  0x90   : > { %v523_v56 = vpop.xlane.xlu1 %522 }
  0x91   : > { %v551_v60 = vmul.f32 0.00390625, %v523_v56  ;;  %v572_v1 = vperm.slane %v549_v59, %v571_v58 }
  0x93   : > { %v574_v4 = vperm.slane %v551_v60, %v571_v58 }
  0x96   : > { %v518_v61 = vpop.xlane.xlu0 %517  ;;  %v533_v62 = vpop.xlane.xlu2 %532 }
  0x97   : > { %v550_v63 = vmul.f32 0.00390625, %v518_v61  ;;  %v553_v7 = vmul.f32 0.00390625, %v533_v62  ;;  %v935_v61 = vld [vmem:[%s1162_s4] ss:$0 sm:$0xff] }
  0x98   : > { %v528_v0 = vpop.xlane.xlu1 %527 }
  0x99   : > { %v573_v2 = vperm.slane %v550_v63, %v571_v58  ;;  %v552_v3 = vmul.f32 0.00390625, %v528_v0  ;;  %v576_v14 = vperm.slane %v553_v7, %v571_v58 }
  0x9b   : > { %v581_v5 = vsel %vm580_vm1, %v573_v2, %v572_v1  ;;  %v575_v6 = vperm.slane %v552_v3, %v571_v58  ;;  %v936_v1 = vld [vmem:[%s1166_s8] ss:$0 sm:$0xff] }
  0x9c   : > { %v583_v8 = vsel %vm582_vm2, %v574_v4, %v581_v5 }
  0x9d   : > { %v585_v11 = vsel %vm584_vm3, %v575_v6, %v583_v8 }
  0x9e   : > { %v538_v9 = vpop.xlane.xlu2 %537  ;;  %v543_v10 = vpop.xlane.xlu0 %542  ;;  %v587_v19 = vsel %vm586_vm4, %v576_v14, %v585_v11 }
  0x9f   : > { %v554_v12 = vmul.f32 0.00390625, %v538_v9  ;;  %v555_v13 = vmul.f32 0.00390625, %v543_v10 }
  0xa0   : > { %v548_v15 = vpop.xlane.xlu1 %547 }
  0xa1   : > { %v577_v16 = vperm.slane %v554_v12, %v571_v58  ;;  %v578_v17 = vperm.slane %v555_v13, %v571_v58  ;;  %v556_v18 = vmul.f32 0.00390625, %v548_v15 }
  0xa3   : > { %v579_v20 = vperm.slane %v556_v18, %v571_v58  ;;  %v589_v21 = vsel %vm588_vm5, %v577_v16, %v587_v19  ;;  %v934_v58 = vld [vmem:[%s1161_s3] ss:$0 sm:$0xff] }
  0xa4   : > { %v591_v22 = vsel %vm590_vm6, %v578_v17, %v589_v21 }
  0xa5   : > { %v593_v23 = vsel %vm592_vm7, %v579_v20, %v591_v22 }
  0xa6   : > { %900 = vmatmul.msk.f32.vlgmr.msra.gmra.mxu0 %vm594_vm8, %v593_v23 }
  0xa7   : > { %724 = vmatpush.msra.mxu0 %v631_v26 }
  0xa9   : > { %725 = vmatpush.msra.mxu0 %v630_v27 }
  0xab   : > { %726 = vmatpush.msra.mxu0 %v629_v32 }
  0xad   : > { %727 = vmatpush.msra.mxu0 %v628_v33 }
 0x123   : > { %v617_v29 = vpop.f32.mrf.mxu0 }
 0x124   : > { %v618_v30 = vadd.f32 %v933_v28, %v617_v29 }
 0x126   : > { %901 = vmatmul.msk.f32.vlgmr.msra.gmra.mxu1 %vm632_vm9, %v618_v30  ;;  %v657_v31 = vmul.f32 %v618_v30, %v618_v30 }
 0x128   : > { %902 = vmatmul.msk.f32.vlgmr.msra.gmra.mxu2 %vm632_vm9, %v657_v31 }
 0x1a3   : > { %v653_v34 = vpop.f32.mrf.mxu1 }
 0x1a4   : > { %v656_v35 = vmul.f32 0.5, %v653_v34 }
 0x1a6   : > { %903 = vmatmul.msk.f32.vlgmr.msrb.gmra.mxu0 %vm684_vm10, %v656_v35  ;;  %v682_v37 = vmul.f32 %v656_v35, %v656_v35 }
 0x1ab   : > { %v678_v36 = vpop.f32.mrf.mxu2 }
 0x1ac   : > { %v681_v38 = vmul.f32 0.5, %v678_v36 }
 0x1ae   : > { %v683_v39 = vsub.f32 %v681_v38, %v682_v37 }
 0x1b0   : > { %904 = vmatmul.msk.f32.vlgmr.msra.gmra.mxu0 %vm684_vm10, %v683_v39 }
 0x223   : > { %v705_v47 = vpop.f32.mrf.mxu0 }
 0x224   : > { %v708_v57 = vsub.f32 %v618_v30, %v705_v47 }
 0x22d   : > { %v729_v49 = vpop.f32.mrf.mxu0 }
 0x22e   : > { %v730_v50 = vadd.f32 1e-05, %v729_v49 }
 0x230   : > { %937 = vrsqrt.f32 %v730_v50  ;;  %vm738_vm12 = vweird.f32 %v730_v50 }
 0x236   : > { %v938_v51 = vpop.eup %937 }
 0x237   : > { %v733_v52 = vmul.f32 %v938_v51, %v730_v50  ;;  %vm739_vm11 = vweird.f32 %v938_v51 }
 0x238   : > { %vm740_vm13 = vmor %vm738_vm12, %vm739_vm11 }
 0x239   : > { %v734_v53 = vmul.f32 %v938_v51, %v733_v52 }
 0x23b   : > { %v735_v54 = vmul.f32 0.5, %v734_v53 }
 0x23d   : > { %v736_v55 = vsub.f32 1.5, %v735_v54 }
 0x23f   : > { %v737_v56 = vmul.f32 %v938_v51, %v736_v55 }
 0x241   : > { %v741_v59 = vsel %vm740_vm13, %v938_v51, %v737_v56 }
 0x242   : > { %v742_v60 = vmul.f32 %v741_v59, %v708_v57 }
 0x244   : > { %v747_v62 = vmul.f32 %v934_v58, %v742_v60 }
 0x246   : > { %v752_v63 = vadd.f32 %v935_v61, %v747_v62 }
 0x248   : > { %v753_v0 = vmax.f32 %v752_v63, 0.0 }
 0x24a   : > { %905 = vmatmul.msk.f32.vlgmr.msra.gmra.mxu3 %vm632_vm9, %v753_v0  ;;  %754 = vst.msk [vmem:[%s397_s25] sm:$0xff] %vm632_vm9, %v753_v0 }
 0x2cd   : > { %v787_v2 = vpop.f32.mrf.mxu3 }
 0x2ce   : > { %v788_v3 = vadd.f32 %v936_v1, %v787_v2 }
 0x2d0   : > { %790 = vst.msk [vmem:[%s401_s30] sm:$0xff] %vm684_vm10, %v788_v3 }
 0x2d1 PF: > { %s21_s15 = sadd.s32 1, %s961_s15   ;;  %s1169_s13 = smov %s957_s14 }
 0x2d2   : > { %p18_p6 = scmp.ge.s32.totalorder %s21_s15, 4   ;;  %s1170_s14 = smov %s1172_s16 }
 0x2d4   :  { %20 = sbr.rel (!%p18_p6) target bundleno = 2 (0x2), region = 109 }

// kernel: mip_forward.3
= control target key start
LH: loop header
LB: loop body
LE: loop exit
PB: predicated region body
PF: predicated region fallthrough
CT: control target
= control target key end

     0   :  { %s2355_s0 = inlined_call_operand.vmem [shape: f32[2,8,64], index: 0, kind: input, shape index: {}]   ;;  %s2356_s1 = inlined_call_operand.vmem [shape: f32[2,8,32], index: 1, kind: input, shape index: {}]   ;;  %s2357_s2 = inlined_call_operand.vmem [shape: s32[2,1,1], index: 2, kind: input, shape index: {}]   ;;  %s2358_s3 = inlined_call_operand.vmem [shape: f32[8,32], index: 3, kind: input, shape index: {}]   ;;  %s2359_s4 = inlined_call_operand.vmem [shape: f32[4,32,8], index: 4, kind: input, shape index: {}]   ;;  %s2360_s5 = inlined_call_operand.vmem [shape: f32[4,1,8], index: 5, kind: input, shape index: {}]   ;;  %s2361_s6 = inlined_call_operand.vmem [shape: f32[4,32,8], index: 6, kind: input, shape index: {}]   ;;  %s2362_s7 = inlined_call_operand.vmem [shape: f32[4,1,8], index: 7, kind: input, shape index: {}]   ;;  %s2363_s8 = inlined_call_operand.vmem [shape: f32[4,32,8], index: 8, kind: input, shape index: {}]   ;;  %s2364_s9 = inlined_call_operand.vmem [shape: f32[4,1,8], index: 9, kind: input, shape index: {}]   ;;  %s2365_s10 = inlined_call_operand.vmem [shape: f32[4,8,32], index: 10, kind: input, shape index: {}]   ;;  %s2366_s11 = inlined_call_operand.vmem [shape: f32[1,32], index: 11, kind: input, shape index: {}]   ;;  %s2367_s12 = inlined_call_operand.vmem [shape: f32[1,32], index: 12, kind: input, shape index: {}]   ;;  %s2368_s13 = inlined_call_operand.vmem [shape: f32[1,32], index: 13, kind: input, shape index: {}]   ;;  %s2369_s14 = inlined_call_operand.vmem [shape: f32[32,64], index: 14, kind: input, shape index: {}]   ;;  %s2370_s15 = inlined_call_operand.vmem [shape: f32[1,64], index: 15, kind: input, shape index: {}]   ;;  %s2371_s16 = inlined_call_operand.vmem [shape: f32[64,32], index: 16, kind: input, shape index: {}]   ;;  %s2372_s17 = inlined_call_operand.vmem [shape: f32[1,32], index: 17, kind: input, shape index: {}]   ;;  %s2373_s18 = inlined_call_operand.vmem [shape: f32[1,32], index: 18, kind: input, shape index: {}]   ;;  %s2374_s19 = inlined_call_operand.vmem [shape: f32[1,32], index: 19, kind: input, shape index: {}]   ;;  %s2375_s20 = inlined_call_operand.vmem [shape: f32[64,3], index: 20, kind: input, shape index: {}]   ;;  %s2376_s21 = inlined_call_operand.vmem [shape: f32[32,3], index: 21, kind: input, shape index: {}]   ;;  %s2377_s22 = inlined_call_operand.vmem [shape: f32[1,3], index: 22, kind: input, shape index: {}]   ;;  %s2378_s23 = inlined_call_operand.hbm [shape: f32[2,3], index: 23, kind: output, shape index: {}]  }
   0x1   :  { %2386 = sst [smem:[#allocation5_spill]] %s2355_s0 }
   0x2   :  { %2387 = sst [smem:[#allocation6_spill]] %s2356_s1 }
   0x3   :  { %2388 = sst [smem:[#allocation7_spill]] %s2357_s2 }
   0x4   :  { %2389 = sst [smem:[#allocation8_spill]] %s2358_s3 }
   0x5   :  { %2390 = sst [smem:[#allocation9_spill]] %s2359_s4 }
   0x6   :  { %2391 = sst [smem:[#allocation10_spill]] %s2360_s5 }
   0x7   :  { %2392 = sst [smem:[#allocation11_spill]] %s2361_s6 }
   0x8   :  { %2393 = sst [smem:[#allocation12_spill]] %s2362_s7 }
   0x9   :  { %v81_v0 = vlaneseq  ;;  %s2394_s24 = sld [smem:[#allocation7_spill]]  ;;  %v1758_v2 = vmov 0   ;;  %v178_v6 = vld [vmem:[%s2363_s8 + $0x18] sm:$0xff]  ;;  %v177_v10 = vld [vmem:[%s2363_s8 + $0x10] sm:$0xff]  ;;  %v1759_v11 = vmov 0.0  }
   0xa   :  { %1667 = vset.pattern.permute.xlu0 %v1758_v2  ;;  %s2395_s1 = sld [smem:[#allocation9_spill]]  ;;  %195 = vmatpush.msra.mxu2 %v178_v6 }
   0xb   :  { %v82_v4 = vshrl.u32 %v81_v0, 7  ;;  %s2396_s6 = sld [smem:[#allocation11_spill]] }
   0xc   :  { %196 = vmatpush.msra.mxu2 %v177_v10 }
   0xf   :  { %v1668_v1 = vld [vmem:[%s2394_s24] ss:$0 sm:$0xff]  ;;  %v1669_v8 = vld [vmem:[%s2394_s24 + $0x1] ss:$0 sm:$0xff] }
  0x10   :  { %v109_v3 = vld [vmem:[%s2395_s1 + $0x18] sm:$0xff]  ;;  %v108_v7 = vld [vmem:[%s2395_s1 + $0x10] sm:$0xff]  ;;  %vm85_vm0 = vcmp.lt.s32.totalorder %v82_v4, %v1668_v1  ;;  %vm86_vm1 = vcmp.lt.s32.totalorder %v82_v4, %v1669_v8 }
  0x11   :  { %133 = vmatpush.msra.mxu0 %v109_v3  ;;  %v147_v5 = vld [vmem:[%s2396_s6 + $0x18] sm:$0xff]  ;;  %v146_v9 = vld [vmem:[%s2396_s6 + $0x10] sm:$0xff]  ;;  %v1551_v12 = vsel %vm85_vm0, 1.0, %v1759_v11  ;;  %v1552_v13 = vsel %vm86_vm1, 1.0, %v1759_v11 }
  0x12   :  { %164 = vmatpush.msra.mxu1 %v147_v5  ;;  %94 = vperm.xlu0 %1667, %v1551_v12  }
  0x13   :  { %134 = vmatpush.msra.mxu0 %v108_v7 }
  0x14   :  { %165 = vmatpush.msra.mxu1 %v146_v9 }
  0x15   :  { %28 = vsyncpa [#allocation3], 0  ;;  %v107_v14 = vld [vmem:[%s2395_s1 + $0x8] sm:$0xff]  ;;  %v106_v17 = vld [vmem:[%s2395_s1] sm:$0xff]  ;;  %s2397_s7 = sld [smem:[#allocation8_spill]]  ;;  %vm114_vm2 = vcmask 261120  }
  0x16   :  { %v145_v15 = vld [vmem:[%s2396_s6 + $0x8] sm:$0xff]  ;;  %135 = vmatpush.msra.mxu0 %v107_v14  ;;  %v144_v18 = vld [vmem:[%s2396_s6] sm:$0xff]  ;;  %v1568_v20 = vld [vmem:[%s2395_s1 + $0x38] sm:$0xff]  ;;  %s2398_s3 = sld [smem:[#allocation6_spill]]  ;;  %vm206_vm3 = vcmask 64512   ;;  %s1761_s27 = smov [#allocation2]  }
  0x17   :  { %v176_v16 = vld [vmem:[%s2363_s8 + $0x8] sm:$0xff]  ;;  %166 = vmatpush.msra.mxu1 %v145_v15  ;;  %v175_v19 = vld [vmem:[%s2363_s8] sm:$0xff]  ;;  %v1575_v21 = vld [vmem:[%s2396_s6 + $0x38] sm:$0xff]  ;;  %s2399_s5 = sld [smem:[#allocation12_spill]] }
  0x18   :  { %197 = vmatpush.msra.mxu2 %v176_v16  ;;  %136 = vmatpush.msra.mxu0 %v106_v17  ;;  %v1567_v22 = vld [vmem:[%s2395_s1 + $0x30] sm:$0xff]  ;;  %v1566_v24 = vld [vmem:[%s2395_s1 + $0x28] sm:$0xff]  ;;  %v1565_v26 = vld [vmem:[%s2395_s1 + $0x20] sm:$0xff]  ;;  %s2400_s2 = sld [smem:[#allocation10_spill]] }
  0x19   :  { %167 = vmatpush.msra.mxu1 %v144_v18  ;;  %v1574_v23 = vld [vmem:[%s2396_s6 + $0x30] sm:$0xff]  ;;  %v1573_v25 = vld [vmem:[%s2396_s6 + $0x28] sm:$0xff]  ;;  %v1572_v27 = vld [vmem:[%s2396_s6 + $0x20] sm:$0xff] }
  0x1a   :  { %99 = vperm.xlu0 %1667, %v1552_v13   ;;  %198 = vmatpush.msra.mxu2 %v175_v19  ;;  %v1672_v43 = vld [vmem:[%s2364_s9] ss:$0 sm:$0xff]  ;;  %v1582_v7 = vld [vmem:[%s2363_s8 + $0x38] sm:$0xff]  ;;  %v1581_v8 = vld [vmem:[%s2363_s8 + $0x30] sm:$0xff] }
  0x1b   :  { %378 = vmatpush.msrb.mxu1 %v1568_v20  ;;  %v91_v28 = vld [vmem:[%s2397_s7] sm:$0xff]  ;;  %v1580_v9 = vld [vmem:[%s2363_s8 + $0x28] sm:$0xff] }
  0x1c   :  { %411 = vmatpush.msrb.mxu2 %v1575_v21  ;;  %v77_v30 = vld [vmem:[%s2398_s3] sm:$0xff]  ;;  %v78_v34 = vld [vmem:[%s2398_s3 + $0x8] sm:$0xff] }
  0x1d   :  { %379 = vmatpush.msrb.mxu1 %v1567_v22  ;;  %v1671_v37 = vld [vmem:[%s2399_s5] ss:$0 sm:$0xff]  ;;  %v2003_v52 = vld [vmem:[%s2399_s5 + $0x1] ss:$0 sm:$0xff] }
  0x1e   :  { %412 = vmatpush.msrb.mxu2 %v1574_v23  ;;  %v1670_v38 = vld [vmem:[%s2400_s2] ss:$0 sm:$0xff] }
  0x1f   :  { %380 = vmatpush.msrb.mxu1 %v1566_v24  ;;  %v1579_v10 = vld [vmem:[%s2363_s8 + $0x20] sm:$0xff] }
  0x20   :  { %413 = vmatpush.msrb.mxu2 %v1573_v25 }
  0x21   :  { %381 = vmatpush.msrb.mxu1 %v1565_v26 }
  0x22   :  { %414 = vmatpush.msrb.mxu2 %v1572_v27 }
  0x84   :  { %v1951_v29 = vpop.permute.xlu0 %94 }
  0x85   :  { %v102_v31 = vmul.f32 %v1951_v29, %v91_v28 }
  0x87   :  { %v1957_v32 = vadd.f32 %v102_v31, %v77_v30 }
  0x89   :  { %1553 = vmatmul.msk.f32.vlgmr.msra.gmra.mxu0 %vm114_vm2, %v1957_v32  ;;  %1555 = vmatmul.msk.f32.vlgmr.msra.gmra.mxu1 %vm114_vm2, %v1957_v32 }
  0x8a   :  { %1557 = vmatmul.msk.f32.vlgmr.msra.gmra.mxu2 %vm114_vm2, %v1957_v32 }
  0x8c   :  { %v1965_v33 = vpop.permute.xlu0 %99 }
  0x8d   :  { %v103_v35 = vmul.f32 %v1965_v33, %v91_v28 }
  0x8f   :  { %v1971_v36 = vadd.f32 %v103_v35, %v78_v34 }
  0x91   :  { %1554 = vmatmul.msk.f32.gmra.mxu0 %vm114_vm2, %v1971_v36  ;;  %1556 = vmatmul.msk.f32.gmra.mxu1 %vm114_vm2, %v1971_v36 }
  0x92   :  { %1558 = vmatmul.msk.f32.gmra.mxu2 %vm114_vm2, %v1971_v36 }
  0x99   :  { %1570 = vmatmul.msk.f32.vlgmr.msrb.gmra.mxu1 %vm114_vm2, %v1957_v32 }
  0x9a   :  { %1577 = vmatmul.msk.f32.vlgmr.msrb.gmra.mxu2 %vm114_vm2, %v1957_v32 }
  0xa1   :  { %1571 = vmatmul.msk.f32.gmra.mxu1 %vm114_vm2, %v1971_v36 }
  0xa2   :  { %1578 = vmatmul.msk.f32.gmra.mxu2 %vm114_vm2, %v1971_v36 }
 0x106   :  { %v138_v39 = vpop.f32.mrf.mxu0  ;;  %v169_v40 = vpop.f32.mrf.mxu1 }
 0x107   :  { %v170_v41 = vadd.f32 %v1671_v37, %v169_v40  ;;  %v139_v42 = vadd.f32 %v1670_v38, %v138_v39 }
 0x109   :  { %1559 = vmatpush.xpose.msk.msrb.mxu0 %vm206_vm3, %v170_v41 }
 0x10c   :  { %1560 = vmatmul.msk.f32.vlgmr.msrb.gmra.mxu0 %vm206_vm3, %v139_v42  ;;  %v1673_v42 = vld [vmem:[%s2400_s2 + $0x1] ss:$0 sm:$0xff] }
 0x10d   :  { %v200_v44 = vpop.f32.mrf.mxu2 }
 0x10e   :  { %v172_v45 = vpop.f32.mrf.mxu1  ;;  %v141_v46 = vpop.f32.mrf.mxu0  ;;  %v201_v48 = vadd.f32 %v1672_v43, %v200_v44 }
 0x10f   :  { %v173_v47 = vadd.f32 %v1671_v37, %v172_v45  ;;  %v142_v49 = vadd.f32 %v1670_v38, %v141_v46  ;;  %v355_v46 = vld [vmem:[%s2365_s10] sm:$0xff] }
 0x111   :  { %1561 = vmatpush.xpose.msk.msra.mxu3 %vm206_vm3, %v173_v47 }
 0x114   :  { %1562 = vmatmul.msk.f32.vlgmr.msra.gmra.mxu3 %vm206_vm3, %v142_v49 }
 0x115   :  { %327 = vmatpush.msrb.mxu3 %v201_v48  ;;  %v203_v50 = vpop.f32.mrf.mxu2  ;;  %v1675_v48 = vld [vmem:[%s2364_s9 + $0x1] ss:$0 sm:$0xff] }
 0x116   :  { %v204_v51 = vadd.f32 %v1672_v43, %v203_v50  ;;  %v383_v41 = vpop.f32.mrf.mxu1 }
 0x117   :  { %444 = vmatpush.msra.mxu3 %v1582_v7  ;;  %v384_v43 = vadd.f32 %v1673_v42, %v383_v41  ;;  %v1599_v7 = vld [vmem:[%s2395_s1 + $0x50] sm:$0xff] }
 0x118   :  { %350 = vmatpush.msra.mxu0 %v204_v51 }
 0x119   :  { %445 = vmatpush.msra.mxu3 %v1581_v8  ;;  %v1598_v8 = vld [vmem:[%s2395_s1 + $0x48] sm:$0xff] }
 0x11b   :  { %446 = vmatpush.msra.mxu3 %v1580_v9  ;;  %v1597_v9 = vld [vmem:[%s2395_s1 + $0x40] sm:$0xff] }
 0x11d   :  { %v416_v53 = vpop.f32.mrf.mxu2  ;;  %447 = vmatpush.msra.mxu3 %v1579_v10  ;;  %v1607_v10 = vld [vmem:[%s2396_s6 + $0x58] sm:$0xff] }
 0x11e   :  { %v417_v54 = vadd.f32 %v2003_v52, %v416_v53  ;;  %v386_v44 = vpop.f32.mrf.mxu1 }
 0x11f   :  { %v387_v45 = vadd.f32 %v1673_v42, %v386_v44  ;;  %v1592_v42 = vld [vmem:[%s2365_s10 + $0x8] sm:$0xff]  ;;  %v1613_v44 = vld [vmem:[%s2363_s8 + $0x50] sm:$0xff] }
 0x120   :  { %1586 = vmatpush.xpose.msk.msrb.mxu0 %vm206_vm3, %v417_v54 }
 0x125   :  { %v419_v35 = vpop.f32.mrf.mxu2 }
 0x126   :  { %v420_v40 = vadd.f32 %v2003_v52, %v419_v35 }
 0x189   :  { %v230_v55 = vpop.f32.mrf.mxu0 }
 0x18a   :  { %v259_v56 = vmul.f32 0.35355338, %v230_v55 }
 0x18c   :  { %v261_v57 = vsel %vm206_vm3, %v259_v56, -inf }
 0x18d   :  { %262 = vmax.xlane.f32.xlu2 %v261_v57 }
 0x197   :  { %v256_v58 = vpop.f32.mrf.mxu3 }
 0x198   :  { %v260_v59 = vmul.f32 0.35355338, %v256_v58 }
 0x19a   :  { %v264_v60 = vsel %vm206_vm3, %v260_v59, -inf }
 0x19b   :  { %265 = vmax.xlane.f32.xlu1 %v264_v60 }
 0x200   :  { %v263_v61 = vpop.xlane.xlu2 %262 }
 0x201   :  { %v267_v62 = vsub.f32 %v259_v56, %v263_v61 }
 0x203   :  { %v269_v63 = vmul.f32 1.442695, %v267_v62 }
 0x205   :  { %1690 = vpow2.f32 %v269_v63 }
 0x20b   :  { %v1691_v0 = vpop.eup %1690 }
 0x20c   :  { %v273_v1 = vsel %vm206_vm3, %v1691_v0, 0.0 }
 0x20d   :  { %274 = vadd.xlane.f32.xlu2 %v273_v1 }
 0x20e   :  { %v266_v2 = vpop.xlane.xlu1 %265 }
 0x20f   :  { %v268_v3 = vsub.f32 %v260_v59, %v266_v2 }
 0x211   :  { %v271_v4 = vmul.f32 1.442695, %v268_v3 }
 0x213   :  { %1692 = vpow2.f32 %v271_v4 }
 0x219   :  { %v1693_v5 = vpop.eup %1692 }
 0x21a   :  { %v276_v6 = vsel %vm206_vm3, %v1693_v5, 0.0 }
 0x21b   :  { %277 = vadd.xlane.f32.xlu1 %v276_v6  ;;  %v1600_v6 = vld [vmem:[%s2395_s1 + $0x58] sm:$0xff] }
 0x280   :  { %v275_v11 = vpop.xlane.xlu2 %274 }
 0x281   :  { %1694 = vrcp.f32 %v275_v11  ;;  %v290_v15 = vand.u32 2147483648, %v275_v11  ;;  %v288_v17 = vand.u32 2147483647, %v275_v11  ;;  %vm284_vm5 = vweird.f32 %v275_v11 }
 0x283   :  { %v291_v20 = vor.u32 1.1754944e-38, %v290_v15  ;;  %vm289_vm7 = vcmp.eq.f32.partialorder %v288_v17, 8.507059e+37 }
 0x287   :  { %v1695_v12 = vpop.eup %1694 }
 0x288   :  { %v280_v13 = vmul.f32 %v1695_v12, %v275_v11  ;;  %vm285_vm4 = vweird.f32 %v1695_v12  ;;  %v1606_v11 = vld [vmem:[%s2396_s6 + $0x50] sm:$0xff] }
 0x289   :  { %vm286_vm6 = vmor %vm284_vm5, %vm285_vm4 }
 0x28a   :  { %v281_v14 = vsub.f32 1.0, %v280_v13 }
 0x28c   :  { %v282_v16 = vmul.f32 %v1695_v12, %v281_v14  ;;  %v1604_v14 = vld [vmem:[%s2396_s6 + $0x40] sm:$0xff] }
 0x28e   :  { %v283_v18 = vadd.f32 %v1695_v12, %v282_v16  ;;  %v278_v19 = vpop.xlane.xlu1 %277 }
 0x28f   :  { %1696 = vrcp.f32 %v278_v19  ;;  %v305_v27 = vand.u32 2147483648, %v278_v19  ;;  %v303_v30 = vand.u32 2147483647, %v278_v19  ;;  %vm299_vm9 = vweird.f32 %v278_v19 }
 0x290   :  { %v287_v21 = vsel %vm286_vm6, %v1695_v12, %v283_v18  ;;  %v1605_v12 = vld [vmem:[%s2396_s6 + $0x48] sm:$0xff] }
 0x291   :  { %v292_v22 = vsel %vm289_vm7, %v291_v20, %v287_v21  ;;  %v306_v34 = vor.u32 1.1754944e-38, %v305_v27  ;;  %vm304_vm11 = vcmp.eq.f32.partialorder %v303_v30, 8.507059e+37 }
 0x292   :  { %v293_v23 = vmul.f32 %v1691_v0, %v292_v22 }
 0x294   :  { %1563 = vmatmul.msk.f32.vlgmr.msrb.gmra.mxu3 %vm206_vm3, %v293_v23 }
 0x295   :  { %v1697_v24 = vpop.eup %1696  ;;  %626 = vmatpush.msrb.mxu3 %v1592_v42 }
 0x296   :  { %v295_v25 = vmul.f32 %v1697_v24, %v278_v19  ;;  %vm300_vm8 = vweird.f32 %v1697_v24 }
 0x297   :  { %vm301_vm10 = vmor %vm299_vm9, %vm300_vm8 }
 0x298   :  { %v296_v26 = vsub.f32 1.0, %v295_v25 }
 0x29a   :  { %v297_v28 = vmul.f32 %v1697_v24, %v296_v26 }
 0x29c   :  { %v298_v31 = vadd.f32 %v1697_v24, %v297_v28  ;;  %1584 = vmatmul.msk.f32.vlgmr.msra.gmra.mxu3 %vm114_vm2, %v1957_v32 }
 0x29e   :  { %v302_v37 = vsel %vm301_vm10, %v1697_v24, %v298_v31 }
 0x29f   :  { %v307_v38 = vsel %vm304_vm11, %v306_v34, %v302_v37 }
 0x2a0   :  { %v308_v39 = vmul.f32 %v1693_v5, %v307_v38 }
 0x2a2   :  { %1564 = vmatmul.msk.f32.vlgmr.msra.gmra.mxu0 %vm206_vm3, %v308_v39 }
 0x2a3   :  { %1588 = vmatpush.xpose.msk.msra.mxu0 %vm206_vm3, %v420_v40 }
 0x2a4   :  { %1585 = vmatmul.msk.f32.gmra.mxu3 %vm114_vm2, %v1971_v36 }
 0x2aa   :  { %1587 = vmatmul.msk.f32.vlgmr.msrb.gmra.mxu0 %vm206_vm3, %v384_v43  ;;  %v1614_v43 = vld [vmem:[%s2363_s8 + $0x58] sm:$0xff] }
 0x2ab   :  { %655 = vmatpush.msrb.mxu0 %v355_v46  ;;  %751 = vmatpush.msra.mxu3 %v1614_v43  ;;  %v1611_v46 = vld [vmem:[%s2363_s8 + $0x40] sm:$0xff] }
 0x2ad   :  { %752 = vmatpush.msra.mxu3 %v1613_v44 }
 0x2b2   :  { %1589 = vmatmul.msk.f32.vlgmr.msra.gmra.mxu0 %vm206_vm3, %v387_v45  ;;  %v1612_v45 = vld [vmem:[%s2363_s8 + $0x48] sm:$0xff] }
 0x2b3   :  { %753 = vmatpush.msra.mxu3 %v1612_v45 }
 0x2b5   :  { %754 = vmatpush.msra.mxu3 %v1611_v46 }
 0x317   :  { %v329_v47 = vpop.f32.mrf.mxu3 }
 0x318   :  { %1595 = vmatmul.msk.f32.vlgmr.msrb.gmra.mxu0 %vm206_vm3, %v329_v47  ;;  %v1637_v47 = vld [vmem:[%s2396_s6 + $0x78] sm:$0xff] }
 0x31f   :  { %v352_v49 = vpop.f32.mrf.mxu0  ;;  %v449_v50 = vpop.f32.mrf.mxu3 }
 0x320   :  { %v450_v51 = vadd.f32 %v1675_v48, %v449_v50  ;;  %1596 = vmatmul.msk.f32.gmra.mxu0 %vm206_vm3, %v352_v49  ;;  %v1636_v49 = vld [vmem:[%s2396_s6 + $0x70] sm:$0xff]  ;;  %v1635_v50 = vld [vmem:[%s2396_s6 + $0x68] sm:$0xff] }
 0x322   :  { %575 = vmatpush.msra.mxu1 %v450_v51  ;;  %v1634_v51 = vld [vmem:[%s2396_s6 + $0x60] sm:$0xff]  ;;  %s1540_s6 = sshll.u32 %s1761_s27, 4  ;;  %s1541_s6 = int_to_ptr.vmem [resolvable:$true] %s1540_s6 }
 0x324   :  { %685 = vmatpush.msrb.mxu1 %v1600_v6 }
 0x326   :  { %686 = vmatpush.msrb.mxu1 %v1599_v7 }
 0x327   :  { %v452_v52 = vpop.f32.mrf.mxu3  ;;  %v478_v53 = vpop.f32.mrf.mxu0 }
 0x328   :  { %v453_v54 = vadd.f32 %v1675_v48, %v452_v52  ;;  %v507_v55 = vmul.f32 0.35355338, %v478_v53  ;;  %687 = vmatpush.msrb.mxu1 %v1598_v8  ;;  %v1677_v53 = vld [vmem:[%s2399_s5 + $0x2] ss:$0 sm:$0xff] }
 0x32a   :  { %598 = vmatpush.msra.mxu2 %v453_v54  ;;  %v509_v56 = vsel %vm206_vm3, %v507_v55, -inf  ;;  %688 = vmatpush.msrb.mxu1 %v1597_v9 }
 0x32b   :  { %510 = vmax.xlane.f32.xlu1 %v509_v56 }
 0x32c   :  { %718 = vmatpush.msrb.mxu2 %v1607_v10 }
 0x32e   :  { %719 = vmatpush.msrb.mxu2 %v1606_v11 }
 0x32f   :  { %v504_v57 = vpop.f32.mrf.mxu0 }
 0x330   :  { %v508_v58 = vmul.f32 0.35355338, %v504_v57  ;;  %720 = vmatpush.msrb.mxu2 %v1605_v12 }
 0x332   :  { %v512_v59 = vsel %vm206_vm3, %v508_v58, -inf  ;;  %721 = vmatpush.msrb.mxu2 %v1604_v14 }
 0x333   :  { %513 = vmax.xlane.f32.xlu0 %v512_v59 }
 0x39e   :  { %v511_v60 = vpop.xlane.xlu1 %510 }
 0x39f   :  { %v515_v61 = vsub.f32 %v507_v55, %v511_v60  ;;  %v1676_v55 = vld [vmem:[%s2400_s2 + $0x2] ss:$0 sm:$0xff] }
 0x3a1   :  { %v517_v62 = vmul.f32 1.442695, %v515_v61 }
 0x3a3   :  { %1698 = vpow2.f32 %v517_v62 }
 0x3a6   :  { %v514_v63 = vpop.xlane.xlu0 %513 }
 0x3a7   :  { %v516_v0 = vsub.f32 %v508_v58, %v514_v63  ;;  %v2129_v63 = vpop.f32.mrf.mxu0 }
 0x3a9   :  { %v1699_v1 = vpop.eup %1698  ;;  %v519_v2 = vmul.f32 1.442695, %v516_v0 }
 0x3aa   :  { %v521_v3 = vsel %vm206_vm3, %v1699_v1, 0.0 }
 0x3ab   :  { %1700 = vpow2.f32 %v519_v2  ;;  %522 = vadd.xlane.f32.xlu1 %v521_v3 }
 0x3af   :  { %v660_v2 = vpop.f32.mrf.mxu0 }
 0x3b1   :  { %v1701_v4 = vpop.eup %1700 }
 0x3b2   :  { %v524_v5 = vsel %vm206_vm3, %v1701_v4, 0.0 }
 0x3b3   :  { %525 = vadd.xlane.f32.xlu2 %v524_v5  ;;  %v1678_v5 = vld [vmem:[%s2364_s9 + $0x2] ss:$0 sm:$0xff] }
 0x41e   :  { %v523_v13 = vpop.xlane.xlu1 %522 }
 0x41f   :  { %1702 = vrcp.f32 %v523_v13  ;;  %v538_v19 = vand.u32 2147483648, %v523_v13  ;;  %v536_v21 = vand.u32 2147483647, %v523_v13  ;;  %vm532_vm13 = vweird.f32 %v523_v13 }
 0x421   :  { %v539_v24 = vor.u32 1.1754944e-38, %v538_v19  ;;  %vm537_vm15 = vcmp.eq.f32.partialorder %v536_v21, 8.507059e+37 }
 0x425   :  { %v1703_v15 = vpop.eup %1702 }
 0x426   :  { %v528_v16 = vmul.f32 %v1703_v15, %v523_v13  ;;  %v526_v17 = vpop.xlane.xlu2 %525  ;;  %vm533_vm12 = vweird.f32 %v1703_v15 }
 0x427   :  { %1704 = vrcp.f32 %v526_v17  ;;  %vm534_vm14 = vmor %vm532_vm13, %vm533_vm12  ;;  %v553_v31 = vand.u32 2147483648, %v526_v17  ;;  %v551_v35 = vand.u32 2147483647, %v526_v17  ;;  %vm547_vm1 = vweird.f32 %v526_v17 }
 0x428   :  { %v529_v18 = vsub.f32 1.0, %v528_v16  ;;  %v1679_v16 = vld [vmem:[%s2399_s5 + $0x3] ss:$0 sm:$0xff] }
 0x429   :  { %v554_v38 = vor.u32 1.1754944e-38, %v553_v31  ;;  %vm552_vm5 = vcmp.eq.f32.partialorder %v551_v35, 8.507059e+37  ;;  %v1629_v31 = vld [vmem:[%s2395_s1 + $0x70] sm:$0xff]  ;;  %v1627_v35 = vld [vmem:[%s2395_s1 + $0x60] sm:$0xff] }
 0x42a   :  { %v530_v20 = vmul.f32 %v1703_v15, %v529_v18 }
 0x42c   :  { %v531_v22 = vadd.f32 %v1703_v15, %v530_v20 }
 0x42d   :  { %v1705_v23 = vpop.eup %1704 }
 0x42e   :  { %v535_v25 = vsel %vm534_vm14, %v1703_v15, %v531_v22  ;;  %v543_v26 = vmul.f32 %v1705_v23, %v526_v17  ;;  %vm548_vm0 = vweird.f32 %v1705_v23 }
 0x42f   :  { %v540_v27 = vsel %vm537_vm15, %v539_v24, %v535_v25  ;;  %vm549_vm4 = vmor %vm547_vm1, %vm548_vm0 }
 0x430   :  { %v544_v28 = vsub.f32 1.0, %v543_v26  ;;  %v541_v30 = vmul.f32 %v1699_v1, %v540_v27  ;;  %v1624_v1 = vld [vmem:[%s2365_s10 + $0x10] sm:$0xff] }
 0x432   :  { %v545_v34 = vmul.f32 %v1705_v23, %v544_v28  ;;  %1590 = vmatmul.msk.f32.vlgmr.msra.gmra.mxu1 %vm206_vm3, %v541_v30  ;;  %v1630_v30 = vld [vmem:[%s2395_s1 + $0x78] sm:$0xff] }
 0x434   :  { %v546_v37 = vadd.f32 %v1705_v23, %v545_v34  ;;  %v1628_v34 = vld [vmem:[%s2395_s1 + $0x68] sm:$0xff] }
 0x436   :  { %v550_v39 = vsel %vm549_vm4, %v1705_v23, %v546_v37  ;;  %v1644_v37 = vld [vmem:[%s2363_s8 + $0x78] sm:$0xff] }
 0x437   :  { %v555_v40 = vsel %vm552_vm5, %v554_v38, %v550_v39  ;;  %v1643_v38 = vld [vmem:[%s2363_s8 + $0x70] sm:$0xff]  ;;  %v1642_v39 = vld [vmem:[%s2363_s8 + $0x68] sm:$0xff] }
 0x438   :  { %v556_v41 = vmul.f32 %v1701_v4, %v555_v40 }
 0x43a   :  { %1591 = vmatmul.msk.f32.vlgmr.msra.gmra.mxu2 %vm206_vm3, %v556_v41  ;;  %1602 = vmatmul.msk.f32.vlgmr.msrb.gmra.mxu1 %vm114_vm2, %v1957_v32  ;;  %v1641_v41 = vld [vmem:[%s2363_s8 + $0x60] sm:$0xff] }
 0x442   :  { %1603 = vmatmul.msk.f32.gmra.mxu1 %vm114_vm2, %v1971_v36  ;;  %1609 = vmatmul.msk.f32.vlgmr.msrb.gmra.mxu2 %vm114_vm2, %v1957_v32 }
 0x44a   :  { %1610 = vmatmul.msk.f32.gmra.mxu2 %vm114_vm2, %v1971_v36 }
 0x4af   :  { %v577_v48 = vpop.f32.mrf.mxu1 }
 0x4b0   :  { %1593 = vmatmul.msk.f32.vlgmr.msrb.gmra.mxu3 %vm206_vm3, %v577_v48 }
 0x4b1   :  { %998 = vmatpush.msrb.mxu3 %v1637_v47 }
 0x4b3   :  { %999 = vmatpush.msrb.mxu3 %v1636_v49 }
 0x4b5   :  { %1000 = vmatpush.msrb.mxu3 %v1635_v50 }
 0x4b7   :  { %1001 = vmatpush.msrb.mxu3 %v1634_v51  ;;  %v690_v54 = vpop.f32.mrf.mxu1 }
 0x4b8   :  { %v691_v58 = vadd.f32 %v1676_v55, %v690_v54 }
 0x4bd   :  { %v600_v52 = vpop.f32.mrf.mxu2 }
 0x4be   :  { %1594 = vmatmul.msk.f32.gmra.mxu3 %vm206_vm3, %v600_v52 }
 0x4bf   :  { %v693_v60 = vpop.f32.mrf.mxu1 }
 0x4c0   :  { %v694_v62 = vadd.f32 %v1676_v55, %v693_v60 }
 0x4c5   :  { %v723_v56 = vpop.f32.mrf.mxu2 }
 0x4c6   :  { %v724_v57 = vadd.f32 %v1677_v53, %v723_v56  ;;  %1616 = vmatmul.msk.f32.vlgmr.msra.gmra.mxu3 %vm114_vm2, %v1957_v32 }
 0x4c8   :  { %1618 = vmatpush.xpose.msk.msra.mxu0 %vm206_vm3, %v724_v57 }
 0x4cb   :  { %1619 = vmatmul.msk.f32.vlgmr.msra.gmra.mxu0 %vm206_vm3, %v691_v58 }
 0x4cd   :  { %v726_v59 = vpop.f32.mrf.mxu2 }
 0x4ce   :  { %v727_v61 = vadd.f32 %v1677_v53, %v726_v59  ;;  %1617 = vmatmul.msk.f32.gmra.mxu3 %vm114_vm2, %v1971_v36 }
 0x4d0   :  { %1620 = vmatpush.xpose.msk.msra.mxu1 %vm206_vm3, %v727_v61 }
 0x4d3   :  { %1621 = vmatmul.msk.f32.vlgmr.msra.gmra.mxu1 %vm206_vm3, %v694_v62 }
 0x4d4   :  { %933 = vmatpush.msrb.mxu1 %v1624_v1 }
 0x4d6   :  { %1639 = vmatmul.msk.f32.vlgmr.msrb.gmra.mxu3 %vm114_vm2, %v1957_v32 }
 0x4de   :  { %1640 = vmatmul.msk.f32.gmra.mxu3 %vm114_vm2, %v1971_v36 }
 0x533   :  { %v2131_v0 = vpop.f32.mrf.mxu3 }
 0x541   :  { %v631_v3 = vpop.f32.mrf.mxu3 }
 0x542   :  { %v2136_v4 = vadd.f32 %v660_v2, %v631_v3 }
 0x548   :  { %v785_v6 = vpop.f32.mrf.mxu0 }
 0x549   :  { %v814_v7 = vmul.f32 0.35355338, %v785_v6  ;;  %v756_v8 = vpop.f32.mrf.mxu3 }
 0x54a   :  { %v757_v9 = vadd.f32 %v1678_v5, %v756_v8  ;;  %v1681_v8 = vld [vmem:[%s2364_s9 + $0x3] ss:$0 sm:$0xff]  ;;  %s2401_s9 = sld [smem:[#allocation5_spill]] }
 0x54b   :  { %v816_v10 = vsel %vm206_vm3, %v814_v7, -inf }
 0x54c   :  { %817 = vmax.xlane.f32.xlu2 %v816_v10  ;;  %882 = vmatpush.msra.mxu2 %v757_v9 }
 0x54e   :  { %965 = vmatpush.msrb.mxu2 %v1630_v30 }
 0x550   :  { %v811_v11 = vpop.f32.mrf.mxu1  ;;  %966 = vmatpush.msrb.mxu2 %v1629_v31 }
 0x551   :  { %v815_v12 = vmul.f32 0.35355338, %v811_v11  ;;  %v759_v13 = vpop.f32.mrf.mxu3  ;;  %v1680_v11 = vld [vmem:[%s2400_s2 + $0x3] ss:$0 sm:$0xff] }
 0x552   :  { %v760_v14 = vadd.f32 %v1678_v5, %v759_v13  ;;  %967 = vmatpush.msrb.mxu2 %v1628_v34 }
 0x553   :  { %v819_v15 = vsel %vm206_vm3, %v815_v12, -inf }
 0x554   :  { %820 = vmax.xlane.f32.xlu1 %v819_v15  ;;  %905 = vmatpush.msrb.mxu0 %v760_v14 }
 0x555   :  { %968 = vmatpush.msrb.mxu2 %v1627_v35 }
 0x556   :  { %1031 = vmatpush.msra.mxu0 %v1644_v37 }
 0x558   :  { %1032 = vmatpush.msra.mxu0 %v1643_v38 }
 0x559   :  { %v1003_v17 = vpop.f32.mrf.mxu3 }
 0x55a   :  { %v1004_v18 = vadd.f32 %v1679_v16, %v1003_v17  ;;  %1033 = vmatpush.msra.mxu0 %v1642_v39 }
 0x55c   :  { %1648 = vmatpush.xpose.msk.msra.mxu1 %vm206_vm3, %v1004_v18  ;;  %1034 = vmatpush.msra.mxu0 %v1641_v41  ;;  %v658_v18 = vadd.f32 %v2129_v63, %v2131_v0 }
 0x561   :  { %v1006_v52 = vpop.f32.mrf.mxu3 }
 0x562   :  { %v1007_v58 = vadd.f32 %v1679_v16, %v1006_v52 }
 0x5bf   :  { %v818_v19 = vpop.xlane.xlu2 %817 }
 0x5c0   :  { %v822_v20 = vsub.f32 %v814_v7, %v818_v19 }
 0x5c2   :  { %v824_v21 = vmul.f32 1.442695, %v822_v20 }
 0x5c4   :  { %1706 = vpow2.f32 %v824_v21 }
 0x5c7   :  { %v821_v22 = vpop.xlane.xlu1 %820 }
 0x5c8   :  { %v823_v23 = vsub.f32 %v815_v12, %v821_v22 }
 0x5ca   :  { %v1707_v24 = vpop.eup %1706  ;;  %v826_v25 = vmul.f32 1.442695, %v823_v23 }
 0x5cb   :  { %v828_v26 = vsel %vm206_vm3, %v1707_v24, 0.0 }
 0x5cc   :  { %1708 = vpow2.f32 %v826_v25  ;;  %829 = vadd.xlane.f32.xlu2 %v828_v26 }
 0x5d2   :  { %v1709_v27 = vpop.eup %1708 }
 0x5d3   :  { %v831_v28 = vsel %vm206_vm3, %v1709_v27, 0.0 }
 0x5d4   :  { %832 = vadd.xlane.f32.xlu1 %v831_v28 }
 0x63f   :  { %v830_v40 = vpop.xlane.xlu2 %829 }
 0x640   :  { %1710 = vrcp.f32 %v830_v40  ;;  %v845_v46 = vand.u32 2147483648, %v830_v40  ;;  %v843_v48 = vand.u32 2147483647, %v830_v40  ;;  %vm839_vm7 = vweird.f32 %v830_v40 }
 0x642   :  { %v846_v51 = vor.u32 1.1754944e-38, %v845_v46  ;;  %vm844_vm9 = vcmp.eq.f32.partialorder %v843_v48, 8.507059e+37 }
 0x646   :  { %v1711_v42 = vpop.eup %1710 }
 0x647   :  { %v835_v43 = vmul.f32 %v1711_v42, %v830_v40  ;;  %v833_v44 = vpop.xlane.xlu1 %832  ;;  %vm840_vm6 = vweird.f32 %v1711_v42 }
 0x648   :  { %1712 = vrcp.f32 %v833_v44  ;;  %vm841_vm8 = vmor %vm839_vm7, %vm840_vm6  ;;  %v860_v59 = vand.u32 2147483648, %v833_v44  ;;  %v858_v61 = vand.u32 2147483647, %v833_v44  ;;  %vm854_vm11 = vweird.f32 %v833_v44 }
 0x649   :  { %v836_v45 = vsub.f32 1.0, %v835_v43 }
 0x64a   :  { %v861_v1 = vor.u32 1.1754944e-38, %v860_v59  ;;  %vm859_vm13 = vcmp.eq.f32.partialorder %v858_v61, 8.507059e+37 }
 0x64b   :  { %v837_v47 = vmul.f32 %v1711_v42, %v836_v45 }
 0x64d   :  { %v838_v49 = vadd.f32 %v1711_v42, %v837_v47 }
 0x64e   :  { %v1713_v50 = vpop.eup %1712 }
 0x64f   :  { %v842_v53 = vsel %vm841_vm8, %v1711_v42, %v838_v49  ;;  %v850_v54 = vmul.f32 %v1713_v50, %v833_v44  ;;  %vm855_vm10 = vweird.f32 %v1713_v50  ;;  %vm1345_vm8 = vcmask 523264  }
 0x650   :  { %v847_v55 = vsel %vm844_vm9, %v846_v51, %v842_v53  ;;  %vm856_vm12 = vmor %vm854_vm11, %vm855_vm10  ;;  %vm1479_vm9 = vcmask 1041409  }
 0x651   :  { %v851_v56 = vsub.f32 1.0, %v850_v54  ;;  %v848_v57 = vmul.f32 %v1707_v24, %v847_v55 }
 0x653   :  { %v852_v60 = vmul.f32 %v1713_v50, %v851_v56  ;;  %1622 = vmatmul.msk.f32.vlgmr.msra.gmra.mxu2 %vm206_vm3, %v848_v57 }
 0x654   :  { %1650 = vmatpush.xpose.msk.msra.mxu2 %vm206_vm3, %v1007_v58 }
 0x655   :  { %v853_v62 = vadd.f32 %v1713_v50, %v852_v60 }
 0x657   :  { %v857_v2 = vsel %vm856_vm12, %v1713_v50, %v853_v62 }
 0x658   :  { %v862_v3 = vsel %vm859_vm13, %v861_v1, %v857_v2  ;;  %v1654_v2 = vld [vmem:[%s2365_s10 + $0x18] sm:$0xff] }
 0x659   :  { %v863_v5 = vmul.f32 %v1709_v27, %v862_v3  ;;  %v1472_v3 = vld [vmem:[%s2375_s20 + $0x38] sm:$0xff] }
 0x65b   :  { %1623 = vmatmul.msk.f32.vlgmr.msrb.gmra.mxu0 %vm206_vm3, %v863_v5  ;;  %1632 = vmatmul.msk.f32.vlgmr.msrb.gmra.mxu2 %vm114_vm2, %v1957_v32  ;;  %v1471_v5 = vld [vmem:[%s2375_s20 + $0x30] sm:$0xff] }
 0x663   :  { %1633 = vmatmul.msk.f32.gmra.mxu2 %vm114_vm2, %v1971_v36  ;;  %1646 = vmatmul.msk.f32.vlgmr.msra.gmra.mxu0 %vm114_vm2, %v1957_v32 }
 0x66b   :  { %1647 = vmatmul.msk.f32.gmra.mxu0 %vm114_vm2, %v1971_v36 }
 0x6d6   :  { %v884_v6 = vpop.f32.mrf.mxu2 }
 0x6d7   :  { %1625 = vmatmul.msk.f32.vlgmr.msrb.gmra.mxu1 %vm206_vm3, %v884_v6  ;;  %v1470_v6 = vld [vmem:[%s2375_s20 + $0x28] sm:$0xff] }
 0x6d8   :  { %v907_v7 = vpop.f32.mrf.mxu0  ;;  %1213 = vmatpush.msrb.mxu1 %v1654_v2 }
 0x6de   :  { %v970_v9 = vpop.f32.mrf.mxu2 }
 0x6df   :  { %1626 = vmatmul.msk.f32.gmra.mxu1 %vm206_vm3, %v907_v7  ;;  %v971_v13 = vadd.f32 %v1680_v11, %v970_v9  ;;  %v1469_v7 = vld [vmem:[%s2375_s20 + $0x20] sm:$0xff]  ;;  %v1467_v9 = vld [vmem:[%s2375_s20 + $0x10] sm:$0xff] }
 0x6e0   :  { %v1036_v10 = vpop.f32.mrf.mxu0 }
 0x6e1   :  { %v1037_v12 = vadd.f32 %v1681_v8, %v1036_v10  ;;  %v1466_v10 = vld [vmem:[%s2375_s20 + $0x8] sm:$0xff] }
 0x6e3   :  { %1162 = vmatpush.msra.mxu3 %v1037_v12  ;;  %v1465_v12 = vld [vmem:[%s2375_s20] sm:$0xff] }
 0x6e6   :  { %v973_v14 = vpop.f32.mrf.mxu2 }
 0x6e7   :  { %v974_v15 = vadd.f32 %v1680_v11, %v973_v14  ;;  %1649 = vmatmul.msk.f32.vlgmr.msra.gmra.mxu1 %vm206_vm3, %v971_v13  ;;  %v76_v11 = vld [vmem:[%s2401_s9 + $0x8] sm:$0xff]  ;;  %v75_v13 = vld [vmem:[%s2401_s9] sm:$0xff] }
 0x6e8   :  { %v1039_v16 = vpop.f32.mrf.mxu0  ;;  %1516 = vmatpush.msra.mxu1 %v1472_v3  ;;  %v1434_v14 = vmul.f32 %v1965_v33, %v76_v11  ;;  %v1337_v11 = vld [vmem:[%s2371_s16 + $0x20] sm:$0xff] }
 0x6e9   :  { %v1040_v17 = vadd.f32 %v1681_v8, %v1039_v16  ;;  %1651 = vmatmul.msk.f32.vlgmr.msra.gmra.mxu2 %vm206_vm3, %v974_v15  ;;  %v1468_v8 = vld [vmem:[%s2375_s20 + $0x18] sm:$0xff]  ;;  %v1433_v15 = vmul.f32 %v1951_v29, %v75_v13 }
 0x6ea   :  { %1517 = vmatpush.msra.mxu1 %v1471_v5  ;;  %v1442_v16 = vsel %vm1345_vm8, %v1434_v14, 0.0  ;;  %v1336_v14 = vld [vmem:[%s2371_s16 + $0x18] sm:$0xff] }
 0x6eb   :  { %1185 = vmatpush.msrb.mxu0 %v1040_v17  ;;  %v1435_v17 = vsel %vm1345_vm8, %v1433_v15, 0.0 }
 0x6ec   :  { %1518 = vmatpush.msra.mxu1 %v1470_v6  ;;  %v1340_v6 = vld [vmem:[%s2371_s16 + $0x38] sm:$0xff] }
 0x6ed   :  { %1360 = vmatpush.msrb.mxu3 %v1340_v6 }
 0x6ee   :  { %1519 = vmatpush.msra.mxu1 %v1469_v7  ;;  %v1339_v7 = vld [vmem:[%s2371_s16 + $0x30] sm:$0xff] }
 0x6ef   :  { %1361 = vmatpush.msrb.mxu3 %v1339_v7  ;;  %v1476_v7 = vld [vmem:[%s2376_s21 + $0x18] sm:$0xff] }
 0x6f0   :  { %1520 = vmatpush.msra.mxu1 %v1468_v8  ;;  %v1338_v8 = vld [vmem:[%s2371_s16 + $0x28] sm:$0xff]  ;;  %1495 = vmatpush.msra.mxu0 %v1476_v7 }
 0x6f1   :  { %1362 = vmatpush.msrb.mxu3 %v1338_v8  ;;  %v1475_v8 = vld [vmem:[%s2376_s21 + $0x10] sm:$0xff] }
 0x6f2   :  { %1521 = vmatpush.msra.mxu1 %v1467_v9  ;;  %1496 = vmatpush.msra.mxu0 %v1475_v8 }
 0x6f3   :  { %1363 = vmatpush.msrb.mxu3 %v1337_v11 }
 0x6f4   :  { %1522 = vmatpush.msra.mxu1 %v1466_v10 }
 0x6f5   :  { %1364 = vmatpush.msrb.mxu3 %v1336_v14 }
 0x6f6   :  { %1523 = vmatpush.msra.mxu1 %v1465_v12 }
 0x754   :  { %v935_v19 = vpop.f32.mrf.mxu1 }
 0x755   :  { %v2196_v20 = vadd.f32 %v935_v19, %v658_v18  ;;  %v1443_v18 = vrot.slane %v1442_v16, 4  ;;  %v1436_v19 = vrot.slane %v1435_v17, 4 }
 0x75c   :  { %v938_v21 = vpop.f32.mrf.mxu1 }
 0x75d   :  { %v2199_v22 = vadd.f32 %v938_v21, %v2136_v4  ;;  %v1444_v21 = vadd.f32 %v1443_v18, %v1442_v16 }
 0x764   :  { %v1065_v23 = vpop.f32.mrf.mxu1 }
 0x765   :  { %v1094_v24 = vmul.f32 0.35355338, %v1065_v23  ;;  %v1437_v23 = vadd.f32 %v1436_v19, %v1435_v17 }
 0x767   :  { %v1096_v25 = vsel %vm206_vm3, %v1094_v24, -inf }
 0x768   :  { %1097 = vmax.xlane.f32.xlu2 %v1096_v25 }
 0x76c   :  { %v1091_v26 = vpop.f32.mrf.mxu2 }
 0x76d   :  { %v1095_v27 = vmul.f32 0.35355338, %v1091_v26  ;;  %v1438_v26 = vrot.slane %v1437_v23, 2 }
 0x76f   :  { %v1099_v28 = vsel %vm206_vm3, %v1095_v27, -inf }
 0x770   :  { %1100 = vmax.xlane.f32.xlu1 %v1099_v28  ;;  %v1439_v28 = vadd.f32 %v1438_v26, %v1437_v23 }
 0x7db   :  { %v1098_v30 = vpop.xlane.xlu2 %1097 }
 0x7dc   :  { %v1102_v31 = vsub.f32 %v1094_v24, %v1098_v30  ;;  %v1445_v24 = vrot.slane %v1444_v21, 2 }
 0x7de   :  { %v1104_v63 = vmul.f32 1.442695, %v1102_v31 }
 0x7e0   :  { %1714 = vpow2.f32 %v1104_v63  ;;  %v1440_v63 = vrot.slane %v1439_v28, 1 }
 0x7e3   :  { %v1101_v0 = vpop.xlane.xlu1 %1100 }
 0x7e4   :  { %v1103_v34 = vsub.f32 %v1095_v27, %v1101_v0  ;;  %v1446_v27 = vadd.f32 %v1445_v24, %v1444_v21  ;;  %v1683_v24 = vld [vmem:[%s2367_s12] ss:$0 sm:$0xff] }
 0x7e6   :  { %v1715_v35 = vpop.eup %1714  ;;  %v1106_v37 = vmul.f32 1.442695, %v1103_v34  ;;  %v1447_v30 = vrot.slane %v1446_v27, 1  ;;  %v1441_v34 = vadd.f32 %v1440_v63, %v1439_v28  ;;  %v1684_v28 = vld [vmem:[%s2368_s13] ss:$0 sm:$0xff] }
 0x7e7   :  { %v1108_v4 = vsel %vm206_vm3, %v1715_v35, 0.0 }
 0x7e8   :  { %1716 = vpow2.f32 %v1106_v37  ;;  %1109 = vadd.xlane.f32.xlu2 %v1108_v4  ;;  %v1448_v0 = vadd.f32 %v1447_v30, %v1446_v27  ;;  %v1682_v37 = vld [vmem:[%s2366_s11] ss:$0 sm:$0xff]  ;;  %s1542_s11 = sshll.u32 %s2378_s23, 4  ;;  %s1543_s11 = int_to_ptr.hbm [resolvable:$true] %s1542_s11 }
 0x7ee   :  { %v1717_v38 = vpop.eup %1716 }
 0x7ef   :  { %v1111_v39 = vsel %vm206_vm3, %v1717_v38, 0.0 }
 0x7f0   :  { %1112 = vadd.xlane.f32.xlu1 %v1111_v39 }
 0x85b   :  { %v1110_v40 = vpop.xlane.xlu2 %1109 }
 0x85c   :  { %1718 = vrcp.f32 %v1110_v40  ;;  %v1125_v45 = vand.u32 2147483648, %v1110_v40  ;;  %v1123_v47 = vand.u32 2147483647, %v1110_v40  ;;  %vm1119_vm15 = vweird.f32 %v1110_v40 }
 0x85e   :  { %v1126_v50 = vor.u32 1.1754944e-38, %v1125_v45  ;;  %vm1124_vm1 = vcmp.eq.f32.partialorder %v1123_v47, 8.507059e+37  ;;  %v1760_v47 = vmov 32.0  }
 0x862   :  { %v1719_v41 = vpop.eup %1718 }
 0x863   :  { %v1115_v42 = vmul.f32 %v1719_v41, %v1110_v40  ;;  %v1113_v43 = vpop.xlane.xlu1 %1112  ;;  %vm1120_vm14 = vweird.f32 %v1719_v41 }
 0x864   :  { %1720 = vrcp.f32 %v1113_v43  ;;  %vm1121_vm0 = vmor %vm1119_vm15, %vm1120_vm14  ;;  %v1140_v56 = vand.u32 2147483648, %v1113_v43  ;;  %v1138_v58 = vand.u32 2147483647, %v1113_v43  ;;  %vm1134_vm5 = vweird.f32 %v1113_v43 }
 0x865   :  { %v1116_v44 = vsub.f32 1.0, %v1115_v42  ;;  %1722 = vrcp.f32 %v1760_v47 }
 0x866   :  { %v1141_v60 = vor.u32 1.1754944e-38, %v1140_v56  ;;  %vm1139_vm7 = vcmp.eq.f32.partialorder %v1138_v58, 8.507059e+37 }
 0x867   :  { %v1117_v46 = vmul.f32 %v1719_v41, %v1116_v44 }
 0x869   :  { %v1118_v48 = vadd.f32 %v1719_v41, %v1117_v46 }
 0x86a   :  { %v1721_v49 = vpop.eup %1720 }
 0x86b   :  { %v1122_v51 = vsel %vm1121_vm0, %v1719_v41, %v1118_v48  ;;  %v1130_v52 = vmul.f32 %v1721_v49, %v1113_v43  ;;  %vm1135_vm4 = vweird.f32 %v1721_v49  ;;  %v1723_v48 = vpop.eup %1722 }
 0x86c   :  { %v1127_v53 = vsel %vm1124_vm1, %v1126_v50, %v1122_v51  ;;  %vm1136_vm6 = vmor %vm1134_vm5, %vm1135_vm4 }
 0x86d   :  { %v1131_v54 = vsub.f32 1.0, %v1130_v52  ;;  %v1128_v55 = vmul.f32 %v1715_v35, %v1127_v53  ;;  %v1505_v35 = vsel %vm1479_vm9, %v1448_v0, %v1441_v34 }
 0x86f   :  { %v1132_v57 = vmul.f32 %v1721_v49, %v1131_v54  ;;  %1652 = vmatmul.msk.f32.vlgmr.msra.gmra.mxu3 %vm206_vm3, %v1128_v55 }
 0x871   :  { %v1133_v59 = vadd.f32 %v1721_v49, %v1132_v57 }
 0x873   :  { %v1137_v61 = vsel %vm1136_vm6, %v1721_v49, %v1133_v59  ;;  %v1240_v49 = vmul.f32 32.0, %v1723_v48 }
 0x874   :  { %v1142_v62 = vsel %vm1139_vm7, %v1141_v60, %v1137_v61  ;;  %v1297_v60 = vld [vmem:[%s2369_s14 + $0x18] sm:$0xff]  ;;  %v1296_v61 = vld [vmem:[%s2369_s14 + $0x10] sm:$0xff] }
 0x875   :  { %v1143_v1 = vmul.f32 %v1717_v38, %v1142_v62  ;;  %1320 = vmatpush.msrb.mxu2 %v1297_v60  ;;  %v1295_v62 = vld [vmem:[%s2369_s14 + $0x8] sm:$0xff] }
 0x877   :  { %1653 = vmatmul.msk.f32.vlgmr.msrb.gmra.mxu0 %vm206_vm3, %v1143_v1  ;;  %1321 = vmatpush.msrb.mxu2 %v1296_v61  ;;  %v1294_v1 = vld [vmem:[%s2369_s14] sm:$0xff] }
 0x879   :  { %1322 = vmatpush.msrb.mxu2 %v1295_v62 }
 0x87b   :  { %1323 = vmatpush.msrb.mxu2 %v1294_v1 }
 0x8f2   :  { %v1164_v25 = vpop.f32.mrf.mxu3 }
 0x8f3   :  { %1655 = vmatmul.msk.f32.vlgmr.msrb.gmra.mxu1 %vm206_vm3, %v1164_v25 }
 0x8f4   :  { %v1187_v31 = vpop.f32.mrf.mxu0 }
 0x8fb   :  { %1656 = vmatmul.msk.f32.gmra.mxu1 %vm206_vm3, %v1187_v31  ;;  %vm1244_vm3 = vweird.f32 %v1723_v48 }
 0x903   :  { %1662 = vmatmul.msk.f32.vlgmr.msra.gmra.mxu1 %vm1345_vm8, %v1505_v35 }
 0x970   :  { %v1215_v4 = vpop.f32.mrf.mxu1 }
 0x971   :  { %v1221_v38 = vadd.f32 %v1215_v4, %v2196_v20  ;;  %v1241_v20 = vsub.f32 1.0, %v1240_v49  ;;  %v1686_v49 = vld [vmem:[%s2372_s17] ss:$0 sm:$0xff] }
 0x973   :  { %v1227_v39 = vadd.f32 %v1682_v37, %v1221_v38  ;;  %v1242_v50 = vmul.f32 %v1723_v48, %v1241_v20 }
 0x975   :  { %v1229_v40 = vadd.f32 %v1227_v39, %v1957_v32  ;;  %v1243_v51 = vadd.f32 %v1723_v48, %v1242_v50  ;;  %v1335_v39 = vld [vmem:[%s2371_s16 + $0x10] sm:$0xff] }
 0x976   :  { %1365 = vmatpush.msrb.mxu3 %v1335_v39 }
 0x977   :  { %v1233_v41 = vsel %vm114_vm2, %v1229_v40, 0.0  ;;  %v2257_v32 = vsel %vm1244_vm3, %v1723_v48, %v1243_v51 }
 0x978   :  { %1234 = vadd.xlane.f32.xlu2 %v1233_v41  ;;  %v1218_v42 = vpop.f32.mrf.mxu1  ;;  %v1333_v41 = vld [vmem:[%s2371_s16] sm:$0xff] }
 0x979   :  { %v1222_v43 = vadd.f32 %v1218_v42, %v2199_v22  ;;  %v1685_v42 = vld [vmem:[%s2370_s15] ss:$0 sm:$0xff] }
 0x97b   :  { %v1228_v44 = vadd.f32 %v1682_v37, %v1222_v43 }
 0x97d   :  { %v1230_v45 = vadd.f32 %v1228_v44, %v1971_v36 }
 0x97f   :  { %v1236_v46 = vsel %vm114_vm2, %v1230_v45, 0.0 }
 0x980   :  { %1237 = vadd.xlane.f32.xlu0 %v1236_v46 }
 0x9eb   :  { %v1235_v52 = vpop.xlane.xlu2 %1234 }
 0x9ec   :  { %v1246_v53 = vmul.f32 %v2257_v32, %v1235_v52 }
 0x9ee   :  { %v1248_v22 = vsub.f32 %v1229_v40, %v1246_v53  ;;  %v1334_v40 = vld [vmem:[%s2371_s16 + $0x8] sm:$0xff] }
 0x9ef   :  { %1366 = vmatpush.msrb.mxu3 %v1334_v40 }
 0x9f0   :  { %v1250_v54 = vmul.f32 %v1248_v22, %v1248_v22 }
 0x9f1   :  { %1367 = vmatpush.msrb.mxu3 %v1333_v41 }
 0x9f2   :  { %v1252_v36 = vsel %vm114_vm2, %v1250_v54, 0.0 }
 0x9f3   :  { %1253 = vadd.xlane.f32.xlu1 %v1252_v36  ;;  %v1238_v55 = vpop.xlane.xlu0 %1237 }
 0x9f4   :  { %v1247_v56 = vmul.f32 %v2257_v32, %v1238_v55 }
 0x9f6   :  { %v1249_v57 = vsub.f32 %v1230_v45, %v1247_v56 }
 0x9f8   :  { %v1251_v58 = vmul.f32 %v1249_v57, %v1249_v57 }
 0x9fa   :  { %v1255_v59 = vsel %vm114_vm2, %v1251_v58, 0.0 }
 0x9fb   :  { %1256 = vadd.xlane.f32.xlu2 %v1255_v59 }
 0xa66   :  { %v1254_v2 = vpop.xlane.xlu1 %1253 }
 0xa67   :  { %v1258_v3 = vmul.f32 %v1254_v2, %v2257_v32 }
 0xa69   :  { %v1260_v5 = vadd.f32 1e-05, %v1258_v3 }
 0xa6b   :  { %1724 = vrsqrt.f32 %v1260_v5  ;;  %vm1268_vm11 = vweird.f32 %v1260_v5 }
 0xa6e   :  { %v1257_v9 = vpop.xlane.xlu2 %1256 }
 0xa6f   :  { %v1259_v10 = vmul.f32 %v1257_v9, %v2257_v32  ;;  %v1474_v9 = vld [vmem:[%s2376_s21 + $0x8] sm:$0xff] }
 0xa70   :  { %1497 = vmatpush.msra.mxu0 %v1474_v9 }
 0xa71   :  { %v1725_v12 = vpop.eup %1724  ;;  %v1261_v13 = vadd.f32 1e-05, %v1259_v10 }
 0xa72   :  { %v1263_v15 = vmul.f32 %v1725_v12, %v1260_v5  ;;  %vm1269_vm10 = vweird.f32 %v1725_v12 }
 0xa73   :  { %1726 = vrsqrt.f32 %v1261_v13  ;;  %vm1270_vm12 = vmor %vm1268_vm11, %vm1269_vm10  ;;  %vm1278_vm14 = vweird.f32 %v1261_v13 }
 0xa74   :  { %v1264_v16 = vmul.f32 %v1725_v12, %v1263_v15 }
 0xa76   :  { %v1265_v17 = vmul.f32 0.5, %v1264_v16 }
 0xa78   :  { %v1266_v18 = vsub.f32 1.5, %v1265_v17 }
 0xa79   :  { %v1727_v19 = vpop.eup %1726 }
 0xa7a   :  { %v1267_v21 = vmul.f32 %v1725_v12, %v1266_v18  ;;  %v1273_v23 = vmul.f32 %v1727_v19, %v1261_v13  ;;  %vm1279_vm13 = vweird.f32 %v1727_v19 }
 0xa7b   :  { %vm1280_vm15 = vmor %vm1278_vm14, %vm1279_vm13 }
 0xa7c   :  { %v1271_v25 = vsel %vm1270_vm12, %v1725_v12, %v1267_v21  ;;  %v1274_v26 = vmul.f32 %v1727_v19, %v1273_v23  ;;  %v1473_v12 = vld [vmem:[%s2376_s21] sm:$0xff] }
 0xa7d   :  { %v1282_v27 = vmul.f32 %v1271_v25, %v1248_v22  ;;  %1498 = vmatpush.msra.mxu0 %v1473_v12 }
 0xa7e   :  { %v1275_v30 = vmul.f32 0.5, %v1274_v26  ;;  %v1688_v26 = vld [vmem:[%s2374_s19] ss:$0 sm:$0xff] }
 0xa7f   :  { %v1287_v31 = vmul.f32 %v1683_v24, %v1282_v27 }
 0xa80   :  { %v1276_v63 = vsub.f32 1.5, %v1275_v30 }
 0xa81   :  { %v1292_v0 = vadd.f32 %v1684_v28, %v1287_v31 }
 0xa82   :  { %v1277_v34 = vmul.f32 %v1727_v19, %v1276_v63 }
 0xa83   :  { %1657 = vmatmul.msk.f32.vlgmr.msrb.gmra.mxu2 %vm114_vm2, %v1292_v0 }
 0xa84   :  { %v1281_v35 = vsel %vm1280_vm15, %v1727_v19, %v1277_v34 }
 0xa85   :  { %v1283_v37 = vmul.f32 %v1281_v35, %v1249_v57 }
 0xa87   :  { %v1288_v4 = vmul.f32 %v1683_v24, %v1283_v37 }
 0xa89   :  { %v1293_v38 = vadd.f32 %v1684_v28, %v1288_v4 }
 0xa8b   :  { %1658 = vmatmul.msk.f32.gmra.mxu2 %vm114_vm2, %v1293_v38 }
 0xb06   :  { %v1325_v43 = vpop.f32.mrf.mxu2 }
 0xb07   :  { %v1326_v44 = vadd.f32 %v1685_v42, %v1325_v43 }
 0xb09   :  { %v1331_v45 = vmax.f32 %v1326_v44, 0.0 }
 0xb0b   :  { %1659 = vmatmul.msk.f32.vlgmr.msrb.gmra.mxu3 %vm1345_vm8, %v1331_v45 }
 0xb0e   :  { %v1328_v46 = vpop.f32.mrf.mxu2 }
 0xb0f   :  { %v1329_v47 = vadd.f32 %v1685_v42, %v1328_v46 }
 0xb11   :  { %v1332_v48 = vmax.f32 %v1329_v47, 0.0 }
 0xb13   :  { %1660 = vmatmul.msk.f32.gmra.mxu3 %vm1345_vm8, %v1332_v48  ;;  %vm1533_vm8 = vcmask 17408  }
 0xb8e   :  { %v1369_v20 = vpop.f32.mrf.mxu3 }
 0xb8f   :  { %v1370_v50 = vadd.f32 %v1686_v49, %v1369_v20 }
 0xb91   :  { %v1375_v51 = vadd.f32 %v1370_v50, %v1292_v0 }
 0xb93   :  { %v1379_v52 = vsel %vm114_vm2, %v1375_v51, 0.0 }
 0xb94   :  { %1380 = vadd.xlane.f32.xlu0 %v1379_v52 }
 0xb96   :  { %v1372_v53 = vpop.f32.mrf.mxu3 }
 0xb97   :  { %v1373_v22 = vadd.f32 %v1686_v49, %v1372_v53  ;;  %v1525_v53 = vpop.f32.mrf.mxu1 }
 0xb99   :  { %v1376_v54 = vadd.f32 %v1373_v22, %v1293_v38 }
 0xb9b   :  { %v1382_v36 = vsel %vm114_vm2, %v1376_v54, 0.0 }
 0xb9c   :  { %1383 = vadd.xlane.f32.xlu1 %v1382_v36 }
 0xc07   :  { %v1381_v55 = vpop.xlane.xlu0 %1380 }
 0xc08   :  { %v1385_v56 = vmul.f32 %v1381_v55, %v2257_v32 }
 0xc0a   :  { %v1387_v57 = vsub.f32 %v1375_v51, %v1385_v56 }
 0xc0c   :  { %v1389_v58 = vmul.f32 %v1387_v57, %v1387_v57 }
 0xc0e   :  { %v1391_v59 = vsel %vm114_vm2, %v1389_v58, 0.0 }
 0xc0f   :  { %v1384_v60 = vpop.xlane.xlu1 %1383  ;;  %1392 = vadd.xlane.f32.xlu2 %v1391_v59 }
 0xc10   :  { %v1386_v61 = vmul.f32 %v1384_v60, %v2257_v32 }
 0xc12   :  { %v1388_v62 = vsub.f32 %v1376_v54, %v1386_v61 }
 0xc14   :  { %v1390_v1 = vmul.f32 %v1388_v62, %v1388_v62 }
 0xc16   :  { %v1394_v2 = vsel %vm114_vm2, %v1390_v1, 0.0 }
 0xc17   :  { %1395 = vadd.xlane.f32.xlu0 %v1394_v2 }
 0xc82   :  { %v1393_v3 = vpop.xlane.xlu2 %1392 }
 0xc83   :  { %v1397_v5 = vmul.f32 %v1393_v3, %v2257_v32 }
 0xc85   :  { %v1399_v6 = vadd.f32 1e-05, %v1397_v5 }
 0xc87   :  { %1728 = vrsqrt.f32 %v1399_v6  ;;  %vm1407_vm1 = vweird.f32 %v1399_v6 }
 0xc8a   :  { %v1396_v10 = vpop.xlane.xlu0 %1395 }
 0xc8b   :  { %v1398_v11 = vmul.f32 %v1396_v10, %v2257_v32  ;;  %v1687_v32 = vld [vmem:[%s2373_s18] ss:$0 sm:$0xff] }
 0xc8d   :  { %v1729_v13 = vpop.eup %1728  ;;  %v1400_v14 = vadd.f32 1e-05, %v1398_v11 }
 0xc8e   :  { %v1402_v15 = vmul.f32 %v1729_v13, %v1399_v6  ;;  %vm1408_vm0 = vweird.f32 %v1729_v13 }
 0xc8f   :  { %1730 = vrsqrt.f32 %v1400_v14  ;;  %vm1409_vm4 = vmor %vm1407_vm1, %vm1408_vm0  ;;  %vm1417_vm6 = vweird.f32 %v1400_v14 }
 0xc90   :  { %v1403_v16 = vmul.f32 %v1729_v13, %v1402_v15 }
 0xc92   :  { %v1404_v17 = vmul.f32 0.5, %v1403_v16 }
 0xc94   :  { %v1405_v18 = vsub.f32 1.5, %v1404_v17 }
 0xc95   :  { %v1731_v19 = vpop.eup %1730 }
 0xc96   :  { %v1406_v21 = vmul.f32 %v1729_v13, %v1405_v18  ;;  %v1412_v23 = vmul.f32 %v1731_v19, %v1400_v14  ;;  %vm1418_vm5 = vweird.f32 %v1731_v19 }
 0xc97   :  { %vm1419_vm7 = vmor %vm1417_vm6, %vm1418_vm5 }
 0xc98   :  { %v1410_v24 = vsel %vm1409_vm4, %v1729_v13, %v1406_v21  ;;  %v1413_v25 = vmul.f32 %v1731_v19, %v1412_v23 }
 0xc99   :  { %v1421_v27 = vmul.f32 %v1410_v24, %v1387_v57 }
 0xc9a   :  { %v1414_v28 = vmul.f32 0.5, %v1413_v25 }
 0xc9b   :  { %v1426_v30 = vmul.f32 %v1687_v32, %v1421_v27 }
 0xc9c   :  { %v1415_v31 = vsub.f32 1.5, %v1414_v28 }
 0xc9d   :  { %v1431_v63 = vadd.f32 %v1688_v26, %v1426_v30 }
 0xc9e   :  { %v1416_v0 = vmul.f32 %v1731_v19, %v1415_v31 }
 0xc9f   :  { %v1449_v34 = vmul.f32 %v1431_v63, %v1951_v29 }
 0xca0   :  { %v1420_v35 = vsel %vm1419_vm7, %v1731_v19, %v1416_v0 }
 0xca1   :  { %v1422_v37 = vmul.f32 %v1420_v35, %v1388_v62  ;;  %v1451_v4 = vsel %vm114_vm2, %v1449_v34, 0.0 }
 0xca2   :  { %v1452_v38 = vrot.slane %v1451_v4, 4 }
 0xca3   :  { %v1427_v39 = vmul.f32 %v1687_v32, %v1422_v37 }
 0xca4   :  { %v1453_v40 = vadd.f32 %v1452_v38, %v1451_v4 }
 0xca5   :  { %v1432_v41 = vadd.f32 %v1688_v26, %v1427_v39 }
 0xca6   :  { %v1454_v43 = vrot.slane %v1453_v40, 2 }
 0xca7   :  { %v1450_v42 = vmul.f32 %v1432_v41, %v1965_v33  ;;  %v1689_v33 = vld [vmem:[%s2377_s22] ss:$0 sm:$0xff] }
 0xca8   :  { %v1455_v46 = vadd.f32 %v1454_v43, %v1453_v40 }
 0xca9   :  { %v1458_v44 = vsel %vm114_vm2, %v1450_v42, 0.0 }
 0xcaa   :  { %v1459_v45 = vrot.slane %v1458_v44, 4  ;;  %v1456_v49 = vrot.slane %v1455_v46, 1 }
 0xcac   :  { %v1460_v47 = vadd.f32 %v1459_v45, %v1458_v44  ;;  %v1457_v50 = vadd.f32 %v1456_v49, %v1455_v46 }
 0xcae   :  { %v1461_v48 = vrot.slane %v1460_v47, 2 }
 0xcb0   :  { %v1462_v29 = vadd.f32 %v1461_v48, %v1460_v47 }
 0xcb2   :  { %v1463_v20 = vrot.slane %v1462_v29, 1 }
 0xcb4   :  { %v1464_v51 = vadd.f32 %v1463_v20, %v1462_v29 }
 0xcb6   :  { %v1480_v52 = vsel %vm1479_vm9, %v1464_v51, %v1457_v50 }
 0xcb7   :  { %1661 = vmatmul.msk.f32.vlgmr.msra.gmra.mxu0 %vm114_vm2, %v1480_v52 }
 0xd34   :  { %v1500_v22 = vpop.f32.mrf.mxu0 }
 0xd35   :  { %v1526_v54 = vadd.f32 %v1525_v53, %v1500_v22 }
 0xd37   :  { %v1532_v36 = vadd.f32 %v1689_v33, %v1526_v54 }
 0xd39   :  { %1534 = vst.msk [vmem:[#allocation2] sm:$0x3] %vm1533_vm8, %v1532_v36 }
 0xd3a   :  { %1545 = dma.vmem_to_hbm [thread:$0]  %s1541_s6, 32, %s1543_s11, [#allocation3]  }
 0xd3b   :  { %1756 = dma.done.wait [#allocation3], 32  }
 0xd3c   :  { %1757 = vsyncadd [#allocation3], 4294967264 }
 0xd3d   :  { %1550 = vsyncpa [#allocation3], 1 }

</bundles_post_ra>
